<compile_context>
chip_gen: v6e
topology: v6e:2x2x1
jax: 0.10.0
libtpu: 0.0.40
codegen_flags: <defaults>
</compile_context>

<pallas_src>
import functools

import jax
import jax.numpy as jnp
from jax.experimental import pallas as pl
from jax.experimental.pallas import tpu as pltpu


def _make_deepfm_kernel(num_fields):
    def kernel(*refs):
        # refs: e_0..e_{F-1}, fc_sum, w1, b1, w2, b2, w3, bias, out
        e_refs = refs[:num_fields]
        (fc_ref, w1_ref, b1_ref, w2_ref, b2_ref, w3_ref,
         bias_ref, out_ref) = refs[num_fields:]
        # e_refs[f]: (E, bm) bf16  -- gathered field-f embeddings, batch in lanes
        # fc_ref:    (1, bm) f32   -- FM first-order term, pre-reduced over fields
        # w1_ref:    (F, H1, E) bf16, b1_ref: (H1, 1) f32
        # w2_ref:    (H2, H1) f32,    b2_ref: (H2, 1) f32
        # w3_ref:    (H2, 1) f32
        # bias_ref:  (1,) f32 in SMEM (global bias + last Linear bias, folded)
        # out_ref:   (1, bm) f32

        embed_dim = e_refs[0].shape[0]
        bm = out_ref.shape[1]

        # ---- FM second-order term (VPU, f32; upcast per field slab only) ----
        sum_e = jnp.zeros((embed_dim, bm), jnp.float32)
        sum_sq = jnp.zeros((embed_dim, bm), jnp.float32)
        for f in range(num_fields):
            blk = e_refs[f][...].astype(jnp.float32)        # (E, bm)
            sum_e = sum_e + blk
            sum_sq = sum_sq + blk * blk
        fm_second = 0.5 * jnp.sum(sum_e * sum_e - sum_sq,
                                  axis=0, keepdims=True)     # (1, bm)

        # ---- Deep (MLP) component ----
        # Layer 1: accumulate per-field bf16 MXU matmuls in f32.
        h1 = w1_ref.shape[1]
        h = jnp.zeros((h1, bm), jnp.float32)
        for f in range(num_fields):
            h = h + jnp.dot(w1_ref[f], e_refs[f][...],
                            preferred_element_type=jnp.float32)  # (H1, bm)
        h = jnp.maximum(h + b1_ref[...], 0.0)
        # Layer 2 in f32 (matches the reference; tiny cost, kernel is HBM-bound).
        h = jnp.dot(w2_ref[...], h,
                    preferred_element_type=jnp.float32) + b2_ref[...]  # (H2, bm)
        h = jnp.maximum(h, 0.0)
        # N=1 output layer as VPU multiply + sublane reduce (MXU would be ~1% used).
        mlp_y = jnp.sum(h * w3_ref[...], axis=0, keepdims=True)         # (1, bm)

        out_ref[...] = bias_ref[0] + fc_ref[...] + fm_second + mlp_y

    return kernel


def prepare_params(params):
    """One-time parameter prep (bf16 casts, table transpose, weight reshapes)."""
    emb = params["embedding"]                    # (V, E) f32
    V, E = emb.shape
    w1 = params["w1"]                            # (H1, F*E) torch-style (out, in)
    H1 = w1.shape[0]
    F = w1.shape[1] // E
    H2 = params["w2"].shape[0]
    return {
        "table_t": emb.astype(jnp.bfloat16).T,                    # (E, V) bf16
        "fc_vec": params["fc"][:, 0],                             # (V,) f32
        "w1_fhe": w1.reshape(H1, F, E).transpose(1, 0, 2)
                    .astype(jnp.bfloat16),                        # (F, H1, E) bf16
        "b1": params["b1"],                                       # (H1, 1) f32
        "w2": params["w2"],                                       # (H2, H1) f32
        "b2": params["b2"],                                       # (H2, 1) f32
        "w3_col": params["w3"].T,                                 # (H2, 1) f32
        "bias_fold": (params["bias"][0, 0]
                      + params["b3"][0, 0]).reshape(1),           # (1,) f32
    }


def deepfm_forward(x, prep, *, bm=1024):
    """x: (B, F) int32 flat (offset) indices.  Returns y: (B,) float32."""
    B, F = x.shape
    E = prep["table_t"].shape[0]
    H1 = prep["w1_fhe"].shape[1]
    H2 = prep["w2"].shape[0]

    nb = pl.cdiv(B, bm)
    Bp = nb * bm
    if Bp != B:
        # Pad the tiny index tensor (not the gathered activations).
        x = jnp.pad(x, ((0, Bp - B), (0, 0)))

    # Glue: per-field gathers from the transposed table land directly in the
    # (E, Bp) batch-in-lanes layout the kernel consumes -- no transpose pass.
    e_fields = [jnp.take(prep["table_t"], x[:, f], axis=1) for f in range(F)]
    # FM first-order term, pre-reduced over fields -> lane-dense (1, Bp) row.
    fc_sum = jnp.sum(jnp.take(prep["fc_vec"], x, axis=0),
                     axis=1).reshape(1, Bp).astype(jnp.float32)

    kernel = _make_deepfm_kernel(F)

    field_specs = [pl.BlockSpec((E, bm), lambda i: (0, i)) for _ in range(F)]
    in_specs = field_specs + [
        pl.BlockSpec((1, bm), lambda i: (0, i)),          # fc_sum
        pl.BlockSpec((F, H1, E), lambda i: (0, 0, 0)),    # w1 (per-field)
        pl.BlockSpec((H1, 1), lambda i: (0, 0)),          # b1
        pl.BlockSpec((H2, H1), lambda i: (0, 0)),         # w2
        pl.BlockSpec((H2, 1), lambda i: (0, 0)),          # b2
        pl.BlockSpec((H2, 1), lambda i: (0, 0)),          # w3 (column)
        pl.BlockSpec(memory_space=pltpu.MemorySpace.SMEM),  # folded bias scalar
    ]

    out = pl.pallas_call(
        kernel,
        out_shape=jax.ShapeDtypeStruct((1, Bp), jnp.float32),
        grid_spec=pltpu.PrefetchScalarGridSpec(
            num_scalar_prefetch=0,
            grid=(nb,),
            in_specs=in_specs,
            out_specs=pl.BlockSpec((1, bm), lambda i: (0, i)),
        ),
        compiler_params=pltpu.CompilerParams(
            dimension_semantics=("parallel",)),
    )(*e_fields, fc_sum, prep["w1_fhe"], prep["b1"], prep["w2"], prep["b2"],
      prep["w3_col"], prep["bias_fold"])

    return out[0, :B]


def init_params(key, field_dims, embed_dim, mlp_dims):
    """Init mirroring the PyTorch module (weights stored torch-style (out, in)).

    Note: the torch module zero-inits biases; here we use small random biases
    so the bias code paths are actually exercised by the numeric check.
    """
    V = int(sum(field_dims))
    F = len(field_dims)
    H1, H2 = mlp_dims
    k = jax.random.split(key, 9)

    def xavier_normal(kk, shape):
        std = (2.0 / (shape[0] + shape[1])) ** 0.5
        return std * jax.random.normal(kk, shape, dtype=jnp.float32)

    def kaiming_normal(kk, shape):  # shape = (out, in), fan_in mode, relu
        std = (2.0 / shape[1]) ** 0.5
        return std * jax.random.normal(kk, shape, dtype=jnp.float32)

    return {
        "embedding": xavier_normal(k[0], (V, embed_dim)),
        "fc": xavier_normal(k[1], (V, 1)),
        "bias": 0.1 * jax.random.normal(k[2], (1, 1), dtype=jnp.float32),
        "w1": kaiming_normal(k[3], (H1, embed_dim * F)),
        "b1": 0.1 * jax.random.normal(k[4], (H1, 1), dtype=jnp.float32),
        "w2": kaiming_normal(k[5], (H2, H1)),
        "b2": 0.1 * jax.random.normal(k[6], (H2, 1), dtype=jnp.float32),
        "w3": kaiming_normal(k[7], (1, H2)),
        "b3": 0.1 * jax.random.normal(k[8], (1, 1), dtype=jnp.float32),
    }


def deepfm_reference(x, params):
    """Pure-JAX reference of the PyTorch forward (eval mode).

    Uses the same bf16-quantized embedding / w1 values as the kernel (upcast
    to f32); w2 and the hidden activation stay f32 in both, so the comparison
    isolates kernel correctness.
    """
    emb = params["embedding"].astype(jnp.bfloat16).astype(jnp.float32)
    w1 = params["w1"].astype(jnp.bfloat16).astype(jnp.float32)

    embed3 = jnp.take(emb, x, axis=0)                       # (B, F, E)
    fc_vals = jnp.take(params["fc"][:, 0], x, axis=0)       # (B, F)

    fm_y = params["bias"][0, 0] + jnp.sum(fc_vals, axis=1, keepdims=True)
    sum_e = jnp.sum(embed3, axis=1)
    fm_y = fm_y + 0.5 * jnp.sum(sum_e ** 2 - jnp.sum(embed3 ** 2, axis=1),
                                axis=1, keepdims=True)

    h = embed3.reshape(x.shape[0], -1)
    h = jnp.maximum(h @ w1.T + params["b1"][:, 0], 0.0)
    h = jnp.maximum(h @ params["w2"].T + params["b2"][:, 0], 0.0)
    mlp_y = h @ params["w3"].T + params["b3"][0, 0]

    return (fm_y + mlp_y)[:, 0]


if __name__ == "__main__":
    # Module-consistent shapes; batch sized so the grid has 4 tiles (a
    # multiple of 2, so both v7x TensorCores get >= 2 pipelined steps each).
    field_dims = [10, 10, 10, 10]     # -> flat vocab = 40
    embed_dim = 16
    mlp_dims = (32, 16)
    batch = 4096
    bm = 1024

    key = jax.random.PRNGKey(0)
    pkey, xkey = jax.random.split(key)
    params = init_params(pkey, field_dims, embed_dim, mlp_dims)
    prep = prepare_params(params)

    # x: (B, F) int32 flat offset indices (per-field index + field offset).
    F = len(field_dims)
    offsets = jnp.array([0, 10, 20, 30], dtype=jnp.int32)
    raw = jax.random.randint(xkey, (batch, F), 0, field_dims[0], dtype=jnp.int32)
    x = raw + offsets[None, :]

    fwd = jax.jit(functools.partial(deepfm_forward, bm=bm))
    y = fwd(x, prep)
    y = jax.block_until_ready(y)

    y_ref = deepfm_reference(x, params)
    assert y.shape == (batch,)
    assert jnp.allclose(y, y_ref, atol=2e-2, rtol=2e-2), (y[:8], y_ref[:8])

    print("KERNEL_OK")
</pallas_src>

<mosaic_0001>
module attributes {stable_mosaic.version = 11 : i64} {
  func.func @kernel(%arg0: i32, %arg1: memref<16x1024xbf16, #tpu.memory_space<vmem>>, %arg2: memref<16x1024xbf16, #tpu.memory_space<vmem>>, %arg3: memref<16x1024xbf16, #tpu.memory_space<vmem>>, %arg4: memref<16x1024xbf16, #tpu.memory_space<vmem>>, %arg5: memref<1x1024xf32, #tpu.memory_space<vmem>>, %arg6: memref<4x32x16xbf16, #tpu.memory_space<vmem>>, %arg7: memref<32x1xf32, #tpu.memory_space<vmem>>, %arg8: memref<16x32xf32, #tpu.memory_space<vmem>>, %arg9: memref<16x1xf32, #tpu.memory_space<vmem>>, %arg10: memref<16x1xf32, #tpu.memory_space<vmem>>, %arg11: memref<1xf32, #tpu.memory_space<smem>>, %arg12: memref<1x1024xf32, #tpu.memory_space<vmem>>) attributes {dimension_semantics = [#tpu.dimension_semantics<parallel>], iteration_bounds = array<i64: 4>, scalar_prefetch = 0 : i64, scratch_operands = 0 : i64, tpu.core_type = #tpu.core_type<tc>, window_params = [{transform_indices = @transform_0, window_bounds = array<i64: 16, 1024>}, {transform_indices = @transform_1, window_bounds = array<i64: 16, 1024>}, {transform_indices = @transform_2, window_bounds = array<i64: 16, 1024>}, {transform_indices = @transform_3, window_bounds = array<i64: 16, 1024>}, {transform_indices = @transform_4, window_bounds = array<i64: 1, 1024>}, {pipeline_mode = #tpu.pipeline_mode<synchronous>, transform_indices = @transform_5, window_bounds = array<i64: 4, 32, 16>}, {pipeline_mode = #tpu.pipeline_mode<synchronous>, transform_indices = @transform_6, window_bounds = array<i64: 32, 1>}, {pipeline_mode = #tpu.pipeline_mode<synchronous>, transform_indices = @transform_7, window_bounds = array<i64: 16, 32>}, {pipeline_mode = #tpu.pipeline_mode<synchronous>, transform_indices = @transform_8, window_bounds = array<i64: 16, 1>}, {pipeline_mode = #tpu.pipeline_mode<synchronous>, transform_indices = @transform_9, window_bounds = array<i64: 16, 1>}, {transform_indices = @transform_10, window_bounds = array<i64: 1>}, {transform_indices = @transform_11, window_bounds = array<i64: 1, 1024>}]} {
    %cst = arith.constant 0.000000e+00 : f32
    %0 = vector.broadcast %cst : f32 to vector<16x1024xf32>
    %cst_0 = arith.constant 0.000000e+00 : f32
    %1 = vector.broadcast %cst_0 : f32 to vector<16x1024xf32>
    %c0 = arith.constant 0 : index
    %c0_1 = arith.constant 0 : index
    %2 = vector.load %arg1[%c0, %c0_1] : memref<16x1024xbf16, #tpu.memory_space<vmem>>, vector<16x1024xbf16>
    %3 = arith.extf %2 : vector<16x1024xbf16> to vector<16x1024xf32>
    %4 = arith.addf %0, %3 : vector<16x1024xf32>
    %5 = arith.mulf %3, %3 : vector<16x1024xf32>
    %6 = arith.addf %1, %5 : vector<16x1024xf32>
    %c0_2 = arith.constant 0 : index
    %c0_3 = arith.constant 0 : index
    %7 = vector.load %arg2[%c0_2, %c0_3] : memref<16x1024xbf16, #tpu.memory_space<vmem>>, vector<16x1024xbf16>
    %8 = arith.extf %7 : vector<16x1024xbf16> to vector<16x1024xf32>
    %9 = arith.addf %4, %8 : vector<16x1024xf32>
    %10 = arith.mulf %8, %8 : vector<16x1024xf32>
    %11 = arith.addf %6, %10 : vector<16x1024xf32>
    %c0_4 = arith.constant 0 : index
    %c0_5 = arith.constant 0 : index
    %12 = vector.load %arg3[%c0_4, %c0_5] : memref<16x1024xbf16, #tpu.memory_space<vmem>>, vector<16x1024xbf16>
    %13 = arith.extf %12 : vector<16x1024xbf16> to vector<16x1024xf32>
    %14 = arith.addf %9, %13 : vector<16x1024xf32>
    %15 = arith.mulf %13, %13 : vector<16x1024xf32>
    %16 = arith.addf %11, %15 : vector<16x1024xf32>
    %c0_6 = arith.constant 0 : index
    %c0_7 = arith.constant 0 : index
    %17 = vector.load %arg4[%c0_6, %c0_7] : memref<16x1024xbf16, #tpu.memory_space<vmem>>, vector<16x1024xbf16>
    %18 = arith.extf %17 : vector<16x1024xbf16> to vector<16x1024xf32>
    %19 = arith.addf %14, %18 : vector<16x1024xf32>
    %20 = arith.mulf %18, %18 : vector<16x1024xf32>
    %21 = arith.addf %16, %20 : vector<16x1024xf32>
    %22 = arith.mulf %19, %19 : vector<16x1024xf32>
    %23 = arith.subf %22, %21 : vector<16x1024xf32>
    %cst_8 = arith.constant dense<0.000000e+00> : vector<1024xf32>
    %24 = vector.multi_reduction <add>, %23, %cst_8 [0] : vector<16x1024xf32> to vector<1024xf32>
    %25 = vector.shape_cast %24 : vector<1024xf32> to vector<1x1024xf32>
    %cst_9 = arith.constant 5.000000e-01 : f32
    %26 = vector.broadcast %cst_9 : f32 to vector<1x1024xf32>
    %27 = arith.mulf %26, %25 : vector<1x1024xf32>
    %cst_10 = arith.constant 0.000000e+00 : f32
    %28 = vector.broadcast %cst_10 : f32 to vector<32x1024xf32>
    %c0_11 = arith.constant 0 : index
    %c0_12 = arith.constant 0 : index
    %c0_13 = arith.constant 0 : index
    %29 = vector.load %arg6[%c0_11, %c0_12, %c0_13] : memref<4x32x16xbf16, #tpu.memory_space<vmem>>, vector<1x32x16xbf16>
    %30 = vector.shape_cast %29 : vector<1x32x16xbf16> to vector<32x16xbf16>
    %c0_14 = arith.constant 0 : index
    %c0_15 = arith.constant 0 : index
    %31 = vector.load %arg1[%c0_14, %c0_15] : memref<16x1024xbf16, #tpu.memory_space<vmem>>, vector<16x1024xbf16>
    %cst_16 = arith.constant dense<0.000000e+00> : vector<32x1024xf32>
    %32 = tpu.matmul %30, %31, %cst_16 {dimension_numbers = #tpu.dot_dimension_numbers<[1], [0], [0], [1], [0, 0, 1, 1], [], []>} : vector<32x16xbf16>, vector<16x1024xbf16>, vector<32x1024xf32> -> vector<32x1024xf32>
    %33 = arith.addf %28, %32 : vector<32x1024xf32>
    %c1 = arith.constant 1 : index
    %c0_17 = arith.constant 0 : index
    %c0_18 = arith.constant 0 : index
    %34 = vector.load %arg6[%c1, %c0_17, %c0_18] : memref<4x32x16xbf16, #tpu.memory_space<vmem>>, vector<1x32x16xbf16>
    %35 = vector.shape_cast %34 : vector<1x32x16xbf16> to vector<32x16xbf16>
    %c0_19 = arith.constant 0 : index
    %c0_20 = arith.constant 0 : index
    %36 = vector.load %arg2[%c0_19, %c0_20] : memref<16x1024xbf16, #tpu.memory_space<vmem>>, vector<16x1024xbf16>
    %cst_21 = arith.constant dense<0.000000e+00> : vector<32x1024xf32>
    %37 = tpu.matmul %35, %36, %cst_21 {dimension_numbers = #tpu.dot_dimension_numbers<[1], [0], [0], [1], [0, 0, 1, 1], [], []>} : vector<32x16xbf16>, vector<16x1024xbf16>, vector<32x1024xf32> -> vector<32x1024xf32>
    %38 = arith.addf %33, %37 : vector<32x1024xf32>
    %c2 = arith.constant 2 : index
    %c0_22 = arith.constant 0 : index
    %c0_23 = arith.constant 0 : index
    %39 = vector.load %arg6[%c2, %c0_22, %c0_23] : memref<4x32x16xbf16, #tpu.memory_space<vmem>>, vector<1x32x16xbf16>
    %40 = vector.shape_cast %39 : vector<1x32x16xbf16> to vector<32x16xbf16>
    %c0_24 = arith.constant 0 : index
    %c0_25 = arith.constant 0 : index
    %41 = vector.load %arg3[%c0_24, %c0_25] : memref<16x1024xbf16, #tpu.memory_space<vmem>>, vector<16x1024xbf16>
    %cst_26 = arith.constant dense<0.000000e+00> : vector<32x1024xf32>
    %42 = tpu.matmul %40, %41, %cst_26 {dimension_numbers = #tpu.dot_dimension_numbers<[1], [0], [0], [1], [0, 0, 1, 1], [], []>} : vector<32x16xbf16>, vector<16x1024xbf16>, vector<32x1024xf32> -> vector<32x1024xf32>
    %43 = arith.addf %38, %42 : vector<32x1024xf32>
    %c3 = arith.constant 3 : index
    %c0_27 = arith.constant 0 : index
    %c0_28 = arith.constant 0 : index
    %44 = vector.load %arg6[%c3, %c0_27, %c0_28] : memref<4x32x16xbf16, #tpu.memory_space<vmem>>, vector<1x32x16xbf16>
    %45 = vector.shape_cast %44 : vector<1x32x16xbf16> to vector<32x16xbf16>
    %c0_29 = arith.constant 0 : index
    %c0_30 = arith.constant 0 : index
    %46 = vector.load %arg4[%c0_29, %c0_30] : memref<16x1024xbf16, #tpu.memory_space<vmem>>, vector<16x1024xbf16>
    %cst_31 = arith.constant dense<0.000000e+00> : vector<32x1024xf32>
    %47 = tpu.matmul %45, %46, %cst_31 {dimension_numbers = #tpu.dot_dimension_numbers<[1], [0], [0], [1], [0, 0, 1, 1], [], []>} : vector<32x16xbf16>, vector<16x1024xbf16>, vector<32x1024xf32> -> vector<32x1024xf32>
    %48 = arith.addf %43, %47 : vector<32x1024xf32>
    %c0_32 = arith.constant 0 : index
    %c0_33 = arith.constant 0 : index
    %49 = vector.load %arg7[%c0_32, %c0_33] : memref<32x1xf32, #tpu.memory_space<vmem>>, vector<32x1xf32>
    %50 = vector.broadcast %49 : vector<32x1xf32> to vector<32x1024xf32>
    %51 = arith.addf %48, %50 : vector<32x1024xf32>
    %cst_34 = arith.constant 0.000000e+00 : f32
    %52 = vector.broadcast %cst_34 : f32 to vector<32x1024xf32>
    %53 = arith.maximumf %51, %52 : vector<32x1024xf32>
    %c0_35 = arith.constant 0 : index
    %c0_36 = arith.constant 0 : index
    %54 = vector.load %arg8[%c0_35, %c0_36] : memref<16x32xf32, #tpu.memory_space<vmem>>, vector<16x32xf32>
    %cst_37 = arith.constant dense<0.000000e+00> : vector<16x1024xf32>
    %55 = tpu.matmul %54, %53, %cst_37 {dimension_numbers = #tpu.dot_dimension_numbers<[1], [0], [0], [1], [0, 0, 1, 1], [], []>} : vector<16x32xf32>, vector<32x1024xf32>, vector<16x1024xf32> -> vector<16x1024xf32>
    %c0_38 = arith.constant 0 : index
    %c0_39 = arith.constant 0 : index
    %56 = vector.load %arg9[%c0_38, %c0_39] : memref<16x1xf32, #tpu.memory_space<vmem>>, vector<16x1xf32>
    %57 = vector.broadcast %56 : vector<16x1xf32> to vector<16x1024xf32>
    %58 = arith.addf %55, %57 : vector<16x1024xf32>
    %cst_40 = arith.constant 0.000000e+00 : f32
    %59 = vector.broadcast %cst_40 : f32 to vector<16x1024xf32>
    %60 = arith.maximumf %58, %59 : vector<16x1024xf32>
    %c0_41 = arith.constant 0 : index
    %c0_42 = arith.constant 0 : index
    %61 = vector.load %arg10[%c0_41, %c0_42] : memref<16x1xf32, #tpu.memory_space<vmem>>, vector<16x1xf32>
    %62 = vector.broadcast %61 : vector<16x1xf32> to vector<16x1024xf32>
    %63 = arith.mulf %60, %62 : vector<16x1024xf32>
    %cst_43 = arith.constant dense<0.000000e+00> : vector<1024xf32>
    %64 = vector.multi_reduction <add>, %63, %cst_43 [0] : vector<16x1024xf32> to vector<1024xf32>
    %65 = vector.shape_cast %64 : vector<1024xf32> to vector<1x1024xf32>
    %c0_44 = arith.constant 0 : index
    %66 = memref.load %arg11[%c0_44] : memref<1xf32, #tpu.memory_space<smem>>
    %c0_45 = arith.constant 0 : index
    %c0_46 = arith.constant 0 : index
    %67 = vector.load %arg5[%c0_45, %c0_46] : memref<1x1024xf32, #tpu.memory_space<vmem>>, vector<1x1024xf32>
    %68 = vector.broadcast %66 : f32 to vector<1x1024xf32>
    %69 = arith.addf %68, %67 : vector<1x1024xf32>
    %70 = arith.addf %69, %27 : vector<1x1024xf32>
    %71 = arith.addf %70, %65 : vector<1x1024xf32>
    %c0_47 = arith.constant 0 : index
    %c0_48 = arith.constant 0 : index
    %72 = vector.load %arg12[%c0_47, %c0_48] : memref<1x1024xf32, #tpu.memory_space<vmem>>, vector<1x1024xf32>
    tpu.vector_store %arg12[%c0_47, %c0_48], %71 {strides = array<i32>} : memref<1x1024xf32, #tpu.memory_space<vmem>>, vector<1x1024xf32>,
    return
  }
  func.func @transform_0(%arg0: i32) -> (i32, i32) {
    %c0_i32 = arith.constant 0 : i32
    %c0_i32_0 = arith.constant 0 : i32
    return %c0_i32, %arg0 : i32, i32
  }
  func.func @transform_1(%arg0: i32) -> (i32, i32) {
    %c0_i32 = arith.constant 0 : i32
    %c0_i32_0 = arith.constant 0 : i32
    return %c0_i32, %arg0 : i32, i32
  }
  func.func @transform_2(%arg0: i32) -> (i32, i32) {
    %c0_i32 = arith.constant 0 : i32
    %c0_i32_0 = arith.constant 0 : i32
    return %c0_i32, %arg0 : i32, i32
  }
  func.func @transform_3(%arg0: i32) -> (i32, i32) {
    %c0_i32 = arith.constant 0 : i32
    %c0_i32_0 = arith.constant 0 : i32
    return %c0_i32, %arg0 : i32, i32
  }
  func.func @transform_4(%arg0: i32) -> (i32, i32) {
    %c0_i32 = arith.constant 0 : i32
    %c0_i32_0 = arith.constant 0 : i32
    return %c0_i32, %arg0 : i32, i32
  }
  func.func @transform_5(%arg0: i32) -> (i32, i32, i32) {
    %c0_i32 = arith.constant 0 : i32
    %c0_i32_0 = arith.constant 0 : i32
    %c0_i32_1 = arith.constant 0 : i32
    %c0_i32_2 = arith.constant 0 : i32
    return %c0_i32, %c0_i32_0, %c0_i32_1 : i32, i32, i32
  }
  func.func @transform_6(%arg0: i32) -> (i32, i32) {
    %c0_i32 = arith.constant 0 : i32
    %c0_i32_0 = arith.constant 0 : i32
    %c0_i32_1 = arith.constant 0 : i32
    return %c0_i32, %c0_i32_0 : i32, i32
  }
  func.func @transform_7(%arg0: i32) -> (i32, i32) {
    %c0_i32 = arith.constant 0 : i32
    %c0_i32_0 = arith.constant 0 : i32
    %c0_i32_1 = arith.constant 0 : i32
    return %c0_i32, %c0_i32_0 : i32, i32
  }
  func.func @transform_8(%arg0: i32) -> (i32, i32) {
    %c0_i32 = arith.constant 0 : i32
    %c0_i32_0 = arith.constant 0 : i32
    %c0_i32_1 = arith.constant 0 : i32
    return %c0_i32, %c0_i32_0 : i32, i32
  }
  func.func @transform_9(%arg0: i32) -> (i32, i32) {
    %c0_i32 = arith.constant 0 : i32
    %c0_i32_0 = arith.constant 0 : i32
    %c0_i32_1 = arith.constant 0 : i32
    return %c0_i32, %c0_i32_0 : i32, i32
  }
  func.func @transform_10(%arg0: i32) -> i32 {
    %c0_i32 = arith.constant 0 : i32
    %c0_i32_0 = arith.constant 0 : i32
    return %c0_i32 : i32
  }
  func.func @transform_11(%arg0: i32) -> (i32, i32) {
    %c0_i32 = arith.constant 0 : i32
    %c0_i32_0 = arith.constant 0 : i32
    return %c0_i32, %arg0 : i32, i32
  }
}

</mosaic_0001>

<bundles_post_ra>
// kernel: deepfm_forward.1
= control target key start
LH: loop header
LB: loop body
LE: loop exit
PB: predicated region body
PF: predicated region fallthrough
CT: control target
= control target key end

     0   :  { %s4402_s0 = inlined_call_operand.vmem [shape: bf16[16,4096], index: 0, kind: input, shape index: {}]   ;;  %s4403_s1 = inlined_call_operand.vmem [shape: bf16[16,4096], index: 1, kind: input, shape index: {}]   ;;  %s4404_s2 = inlined_call_operand.vmem [shape: bf16[16,4096], index: 2, kind: input, shape index: {}]   ;;  %s4405_s3 = inlined_call_operand.vmem [shape: bf16[16,4096], index: 3, kind: input, shape index: {}]   ;;  %s4406_s4 = inlined_call_operand.vmem [shape: f32[1,4096], index: 4, kind: input, shape index: {}]   ;;  %s4407_s5 = inlined_call_operand.vmem [shape: bf16[4,32,16], index: 5, kind: input, shape index: {}]   ;;  %s4408_s6 = inlined_call_operand.vmem [shape: f32[32,1], index: 6, kind: input, shape index: {}]   ;;  %s4409_s7 = inlined_call_operand.vmem [shape: f32[16,32], index: 7, kind: input, shape index: {}]   ;;  %s4410_s8 = inlined_call_operand.vmem [shape: f32[16,1], index: 8, kind: input, shape index: {}]   ;;  %s4411_s9 = inlined_call_operand.vmem [shape: f32[16,1], index: 9, kind: input, shape index: {}]   ;;  %s4412_s10 = inlined_call_operand.<no memory space> [shape: f32[1], index: 10, kind: input, shape index: {}]   ;;  %s4413_s11 = inlined_call_operand.hbm [shape: f32[1,4096], index: 11, kind: output, shape index: {}]  }
   0x1   :  { %4425 = sst [smem:[#allocation42_spill]] %s4402_s0 }
   0x2   :  { %16 = sst [smem:[#allocation2]] %s4412_s10 }
   0x3   :  { %17 = vsyncpa [#allocation8], 0 }
   0x4   :  { %19 = vsyncpa [#allocation8 + $0x1], 0  ;;  %s3316_s19 = smov 0   ;;  %s3318_s20 = smov 0  }
   0x5   :  { %s3320_s21 = smov 0   ;;  %s3322_s22 = smov 0  }
   0x6 LB: > { %s3337_s10 = sadd.s32 4294967295, %s3246_s22   ;;  %s2930_s23 = sadd.s32 4294967294, %s3246_s22   ;;  %s3246_s22 = sphi %s3322_s22, %s4499_s22   ;;  %s3242_s21 = sphi %s3320_s21, %s4498_s21   ;;  %s3238_s20 = sphi %s3318_s20, %s4497_s20   ;;  %s3234_s19 = sphi %s3316_s19, %s4496_s19  }
   0x7   : > { %s3341_s24 = sadd.s32 1, %s3246_s22   ;;  %s32_s25 = sadd.s32 1, %s3242_s21 }
   0x8   : > { %s29_s26 = ssub.s32 %s3246_s22, %s3341_s24  ;;  %p39_p0 = scmp.ne.s32.totalorder %s3242_s21, %s3238_s20 }
   0x9   : > { %p30_p1 = scmp.eq.s32.totalorder %s29_s26, 0  ;;  %p40_p2 = scmp.eq.s32.totalorder %s3246_s22, 0 }
   0xa   : > { %p299_p3 = scmp.eq.s32.totalorder %s3337_s10, 3  ;;  %p304_p4 = scmp.ne.s32.totalorder %s3238_s20, %s3234_s19 }
   0xb   : > { %s3353_s27 = scalar_select %p30_p1, %s3242_s21, %s32_s25  }
   0xc   : > { %p3355_p5 = por %p40_p2, %p39_p0  ;;  %p3359_p6 = por %p299_p3, %p39_p0 }
   0xd   : > { %p305_p7 = scmp.eq.s32.totalorder %s2930_s23, 3  ;;  %p2932_p9 = scmp.ge.s32.totalorder %s3246_s22, 4 }
   0xf   : > { %p3363_p8 = por %p305_p7, %p304_p4  ;;  %339 = sbr.rel (%p2932_p9) target bundleno = 58 (0x3a), region = 40 }
  0x14   : > { %342 = sbr.rel (!%p3355_p5) target bundleno = 34 (0x22), region = 44  ;;  %s344_s12 = sand.u32 (%p3355_p5), 1, %s3242_s21  }
  0x15   : > { %s3049_s13 = sshll.u32 (%p3355_p5), %s3246_s22, 5  ;;  %s2933_s14 = sshll.u32 (%p3355_p5), %s344_s12, 6 }
  0x16   : > { %s4429_s0 = sld [smem:[#allocation42_spill]] (%p3355_p5)  ;;  %s346_s18 = scalar_lea.vmem (%p3355_p5), [#allocation3], %s2933_s14 }
  0x1c   : > { %s349_s17 = scalar_lea.vmem %s4429_s0, %s3049_s13 }
  0x1d   : > { %v362_v0 = vld [vmem:[%s349_s17] sm:$0xff]  ;;  %v364_v1 = vld [vmem:[%s349_s17 + $0x8] sm:$0xff]  ;;  %v366_v2 = vld [vmem:[%s349_s17 + $0x10] sm:$0xff] }
  0x1e   : > { %363 = vst [vmem:[%s346_s18] sm:$0xff] %v362_v0  ;;  %365 = vst [vmem:[%s346_s18 + $0x8] sm:$0xff] %v364_v1  ;;  %v368_v3 = vld [vmem:[%s349_s17 + $0x18] sm:$0xff]  ;;  %v370_v4 = vld [vmem:[%s349_s17 + $0x80] sm:$0xff] }
  0x1f   : > { %367 = vst [vmem:[%s346_s18 + $0x10] sm:$0xff] %v366_v2  ;;  %v372_v5 = vld [vmem:[%s349_s17 + $0x88] sm:$0xff]  ;;  %369 = vst [vmem:[%s346_s18 + $0x18] sm:$0xff] %v368_v3  ;;  %v374_v6 = vld [vmem:[%s349_s17 + $0x90] sm:$0xff] }
  0x20   : > { %371 = vst [vmem:[%s346_s18 + $0x20] sm:$0xff] %v370_v4  ;;  %373 = vst [vmem:[%s346_s18 + $0x28] sm:$0xff] %v372_v5  ;;  %v376_v7 = vld [vmem:[%s349_s17 + $0x98] sm:$0xff] }
  0x21   : > { %375 = vst [vmem:[%s346_s18 + $0x30] sm:$0xff] %v374_v6  ;;  %377 = vst [vmem:[%s346_s18 + $0x38] sm:$0xff] %v376_v7 }
  0x22 PF: > { %383 = sbr.rel (!%p3355_p5) target bundleno = 42 (0x2a), region = 67  ;;  %s385_s23 = sand.u32 (%p3355_p5), 1, %s3242_s21  }
  0x23   : > { %s3050_s25 = sshll.u32 (%p3355_p5), %s3246_s22, 5  ;;  %s2936_s26 = sshll.u32 (%p3355_p5), %s385_s23, 6 }
  0x24   : > { %s390_s14 = scalar_lea.vmem (%p3355_p5), %s4403_s1, %s3050_s25  ;;  %s387_s15 = scalar_lea.vmem (%p3355_p5), [#allocation4], %s2936_s26 }
  0x25   : > { %v403_v8 = vld [vmem:[%s390_s14] sm:$0xff] (%p3355_p5)  ;;  %v405_v9 = vld [vmem:[%s390_s14 + $0x8] sm:$0xff] (%p3355_p5)  ;;  %v407_v10 = vld [vmem:[%s390_s14 + $0x10] sm:$0xff] (%p3355_p5) }
  0x26   : > { %404 = vst [vmem:[%s387_s15] sm:$0xff] (%p3355_p5), %v403_v8  ;;  %406 = vst [vmem:[%s387_s15 + $0x8] sm:$0xff] (%p3355_p5), %v405_v9  ;;  %v409_v11 = vld [vmem:[%s390_s14 + $0x18] sm:$0xff] (%p3355_p5)  ;;  %v411_v12 = vld [vmem:[%s390_s14 + $0x80] sm:$0xff] (%p3355_p5) }
  0x27   : > { %408 = vst [vmem:[%s387_s15 + $0x10] sm:$0xff] %v407_v10  ;;  %v413_v13 = vld [vmem:[%s390_s14 + $0x88] sm:$0xff]  ;;  %410 = vst [vmem:[%s387_s15 + $0x18] sm:$0xff] %v409_v11  ;;  %v415_v14 = vld [vmem:[%s390_s14 + $0x90] sm:$0xff] }
  0x28   : > { %412 = vst [vmem:[%s387_s15 + $0x20] sm:$0xff] %v411_v12  ;;  %414 = vst [vmem:[%s387_s15 + $0x28] sm:$0xff] %v413_v13  ;;  %v417_v15 = vld [vmem:[%s390_s14 + $0x98] sm:$0xff] }
  0x29   : > { %416 = vst [vmem:[%s387_s15 + $0x30] sm:$0xff] %v415_v14  ;;  %418 = vst [vmem:[%s387_s15 + $0x38] sm:$0xff] %v417_v15 }
  0x2a PF: > { %424 = sbr.rel (!%p3355_p5) target bundleno = 50 (0x32), region = 90  ;;  %s426_s16 = sand.u32 (%p3355_p5), 1, %s3242_s21  }
  0x2b   : > { %s3051_s17 = sshll.u32 (%p3355_p5), %s3246_s22, 5  ;;  %s2939_s18 = sshll.u32 (%p3355_p5), %s426_s16, 6 }
  0x2c   : > { %s431_s26 = scalar_lea.vmem (%p3355_p5), %s4404_s2, %s3051_s17  ;;  %s428_s12 = scalar_lea.vmem (%p3355_p5), [#allocation5], %s2939_s18 }
  0x2d   : > { %v444_v16 = vld [vmem:[%s431_s26] sm:$0xff] (%p3355_p5)  ;;  %v446_v17 = vld [vmem:[%s431_s26 + $0x8] sm:$0xff] (%p3355_p5)  ;;  %v448_v18 = vld [vmem:[%s431_s26 + $0x10] sm:$0xff] (%p3355_p5) }
  0x2e   : > { %445 = vst [vmem:[%s428_s12] sm:$0xff] (%p3355_p5), %v444_v16  ;;  %447 = vst [vmem:[%s428_s12 + $0x8] sm:$0xff] (%p3355_p5), %v446_v17  ;;  %v450_v19 = vld [vmem:[%s431_s26 + $0x18] sm:$0xff] (%p3355_p5)  ;;  %v452_v20 = vld [vmem:[%s431_s26 + $0x80] sm:$0xff] (%p3355_p5) }
  0x2f   : > { %449 = vst [vmem:[%s428_s12 + $0x10] sm:$0xff] %v448_v18  ;;  %v454_v21 = vld [vmem:[%s431_s26 + $0x88] sm:$0xff]  ;;  %451 = vst [vmem:[%s428_s12 + $0x18] sm:$0xff] %v450_v19  ;;  %v456_v22 = vld [vmem:[%s431_s26 + $0x90] sm:$0xff] }
  0x30   : > { %453 = vst [vmem:[%s428_s12 + $0x20] sm:$0xff] %v452_v20  ;;  %455 = vst [vmem:[%s428_s12 + $0x28] sm:$0xff] %v454_v21  ;;  %v458_v23 = vld [vmem:[%s431_s26 + $0x98] sm:$0xff] }
  0x31   : > { %457 = vst [vmem:[%s428_s12 + $0x30] sm:$0xff] %v456_v22  ;;  %459 = vst [vmem:[%s428_s12 + $0x38] sm:$0xff] %v458_v23 }
  0x32 PF: > { %465 = sbr.rel (!%p3355_p5) target bundleno = 58 (0x3a), region = 113  ;;  %s467_s13 = sand.u32 (%p3355_p5), 1, %s3242_s21  }
  0x33   : > { %s3052_s14 = sshll.u32 (%p3355_p5), %s3246_s22, 5  ;;  %s2942_s15 = sshll.u32 (%p3355_p5), %s467_s13, 6 }
  0x34   : > { %s472_s18 = scalar_lea.vmem (%p3355_p5), %s4405_s3, %s3052_s14  ;;  %s469_s23 = scalar_lea.vmem (%p3355_p5), [#allocation6], %s2942_s15 }
  0x35   : > { %v485_v24 = vld [vmem:[%s472_s18] sm:$0xff] (%p3355_p5)  ;;  %v487_v25 = vld [vmem:[%s472_s18 + $0x8] sm:$0xff] (%p3355_p5)  ;;  %v489_v26 = vld [vmem:[%s472_s18 + $0x10] sm:$0xff] (%p3355_p5) }
  0x36   : > { %486 = vst [vmem:[%s469_s23] sm:$0xff] (%p3355_p5), %v485_v24  ;;  %488 = vst [vmem:[%s469_s23 + $0x8] sm:$0xff] (%p3355_p5), %v487_v25  ;;  %v491_v27 = vld [vmem:[%s472_s18 + $0x18] sm:$0xff] (%p3355_p5)  ;;  %v493_v28 = vld [vmem:[%s472_s18 + $0x80] sm:$0xff] (%p3355_p5) }
  0x37   : > { %490 = vst [vmem:[%s469_s23 + $0x10] sm:$0xff] %v489_v26  ;;  %v495_v29 = vld [vmem:[%s472_s18 + $0x88] sm:$0xff]  ;;  %492 = vst [vmem:[%s469_s23 + $0x18] sm:$0xff] %v491_v27  ;;  %v497_v30 = vld [vmem:[%s472_s18 + $0x90] sm:$0xff] }
  0x38   : > { %494 = vst [vmem:[%s469_s23 + $0x20] sm:$0xff] %v493_v28  ;;  %496 = vst [vmem:[%s469_s23 + $0x28] sm:$0xff] %v495_v29  ;;  %v499_v31 = vld [vmem:[%s472_s18 + $0x98] sm:$0xff] }
  0x39   : > { %498 = vst [vmem:[%s469_s23 + $0x30] sm:$0xff] %v497_v30  ;;  %500 = vst [vmem:[%s469_s23 + $0x38] sm:$0xff] %v499_v31 }
  0x3a PF: > { %p2945_p10 = scmp.ge.s32.totalorder %s3246_s22, 1  ;;  %p513_p11 = scmp.lt.s32.totalorder %s3246_s22, 5 }
  0x3c   : > { %p514_p12 = pnand %p2945_p10, %p513_p11 }
  0x3e   : > { %517 = sbr.rel (%p514_p12) target bundleno = 658 (0x292), region = 140 }
  0x43   : > { %s3399_s28 = sand.u32 1, %s3238_s20   ;;  %v3248_v32 = vmov 0   ;;  %vm1050_vm0 = vcmask 130048   ;;  %v3462_v58 = vld [vmem:[%s4407_s5 + $0x10] sm:$0xff]   ;;  %v3521_v25 = vld [vmem:[%s4407_s5 + $0x18] sm:$0xff]   ;;  %vm2249_vm1 = vcmask 261120  }
  0x44   : > { %s3402_s25 = sshll.u32 %s3399_s28, 6  ;;  %1089 = vmatprep.mubr.bf16.mxu0 %v3248_v32  ;;  %1142 = vmatprep.mubr.bf16.mxu1 %v3248_v32  ;;  %s2951_s13 = sshll.u32 %s3337_s10, 3 }
  0x45   : > { %3097 = vset.pattern.permute.xlu1 %v3248_v32  ;;  %3096 = vset.pattern.permute.xlu0 %v3248_v32  ;;  %s3409_s26 = scalar_lea.vmem [#allocation4], %s3402_s25  ;;  %s3487_s14 = scalar_lea.vmem [#allocation3], %s3402_s25 }
  0x46   : > { %v679_v33 = vld [vmem:[%s3409_s26] sm:$0xff]  ;;  %v680_v39 = vld [vmem:[%s3409_s26 + $0x8] sm:$0xff]  ;;  %v3454_v53 = vld [vmem:[%s3409_s26 + $0x10] sm:$0xff]  ;;  %p4349_p13 = scmp.lt.s32.totalorder %s2951_s13, 31  ;;  %s2664_s16 = sld [smem:[#allocation2]] }
  0x47   : > { %v683_v34 = vld [vmem:[%s3409_s26 + $0x20] sm:$0xff]  ;;  %v687_v35 = vunpack.c.l.bf16 %v679_v33  ;;  %v3413_v36 = vunpack.c.h.bf16 %v679_v33  ;;  %v684_v40 = vld [vmem:[%s3409_s26 + $0x28] sm:$0xff]  ;;  %v3421_v42 = vunpack.c.l.bf16 %v680_v39  ;;  %v3423_v43 = vunpack.c.h.bf16 %v680_v39  ;;  %v3457_v54 = vld [vmem:[%s3409_s26 + $0x30] sm:$0xff]  ;;  %s3053_s23 = sshll.u32 %s3337_s10, 7  ;;  %s2788_s17 = scalar_lea.sflag [#allocation8], %s3399_s28 }
  0x48   : > { %v3415_v37 = vunpack.c.l.bf16 %v683_v34  ;;  %v3417_v38 = vunpack.c.h.bf16 %v683_v34  ;;  %v2959_v41 = vcombine.high %v679_v33, %v683_v34  ;;  %v3425_v44 = vunpack.c.l.bf16 %v684_v40  ;;  %v3466_v60 = vld [vmem:[%s3409_s26 + $0x18] sm:$0xff]  ;;  %v3490_v8 = vld [vmem:[%s3487_s14] sm:$0xff]  ;;  %v3508_v16 = vld [vmem:[%s3487_s14 + $0x8] sm:$0xff]  ;;  %s4501_s13 = smov (!%p4349_p13, %s2951_s13), 31 }
  0x49   : > { %v719_v45 = vmul.f32 %v687_v35, %v687_v35  ;;  %v3429_v46 = vmul.f32 %v3413_v36, %v3413_v36  ;;  %v3439_v49 = vunpack.c.h.bf16 %v684_v40  ;;  %v3443_v50 = vmul.f32 %v3421_v42, %v3421_v42  ;;  %v3476_v1 = vld [vmem:[%s3409_s26 + $0x38] sm:$0xff]  ;;  %v3493_v9 = vld [vmem:[%s3487_s14 + $0x20] sm:$0xff]  ;;  %v3535_v30 = vld [vmem:[%s3487_s14 + $0x28] sm:$0xff] }
  0x4a   : > { %v3433_v47 = vmul.f32 %v3415_v37, %v3415_v37  ;;  %v3437_v48 = vmul.f32 %v3417_v38, %v3417_v38  ;;  %1071 = vmatprep.subr.bf16.mxu0 %v2959_v41  ;;  %v3447_v51 = vmul.f32 %v3423_v43, %v3423_v43  ;;  %v3451_v52 = vmul.f32 %v3425_v44, %v3425_v44 }
  0x4b   : > { %v2961_v55 = vcombine.high %v680_v39, %v684_v40  ;;  %v2958_v56 = vcombine.low %v679_v33, %v683_v34  ;;  %v2960_v57 = vcombine.low %v680_v39, %v684_v40  ;;  %v691_v59 = vunpack.c.l.bf16 %v3454_v53  ;;  %v2148_v40 = vld [vmem:[%s4408_s6 + $0x8] sm:$0xff] }
  0x4c   : > { %v3470_v61 = vmul.f32 %v3439_v49, %v3439_v49  ;;  %v692_v62 = vunpack.c.h.bf16 %v3454_v53  ;;  %v699_v63 = vunpack.c.l.bf16 %v3457_v54  ;;  %v700_v0 = vunpack.c.h.bf16 %v3457_v54  ;;  %2158 = vperm.xlu1 %3097, %v2148_v40  }
  0x4d   : > { %1124 = vmatprep.subr.bf16.mxu1 %v2961_v55  ;;  %1072 = vmatpush1.bf16.msra.mxu0 %v2958_v56  ;;  %v2963_v2 = vcombine.high %v3454_v53, %v3457_v54  ;;  %v693_v3 = vunpack.c.l.bf16 %v3466_v60  ;;  %v694_v4 = vunpack.c.h.bf16 %v3466_v60  ;;  %v701_v5 = vunpack.c.l.bf16 %v3476_v1 }
  0x4e   : > { %1125 = vmatpush1.bf16.msra.mxu1 %v2960_v57  ;;  %v702_v6 = vunpack.c.h.bf16 %v3476_v1  ;;  %v2965_v7 = vcombine.high %v3466_v60, %v3476_v1  ;;  %v2962_v10 = vcombine.low %v3454_v53, %v3457_v54  ;;  %v2964_v11 = vcombine.low %v3466_v60, %v3476_v1  ;;  %v2147_v57 = vld [vmem:[%s4408_s6] sm:$0xff] }
  0x4f   : > { %1177 = vmatprep.subr.bf16.mxu0 %v2963_v2  ;;  %v615_v12 = vunpack.c.l.bf16 %v3490_v8  ;;  %v616_v13 = vunpack.c.h.bf16 %v3490_v8  ;;  %v623_v14 = vunpack.c.l.bf16 %v3493_v9  ;;  %v624_v15 = vunpack.c.h.bf16 %v3493_v9  ;;  %v2150_v2 = vld [vmem:[%s4408_s6 + $0x18] sm:$0xff] }
  0x50   : > { %2966 = vmatmul.mubr.msk.bf16.vlgmr.msra.gmra.mxu0 %vm1050_vm0, %v3462_v58  ;;  %1230 = vmatprep.subr.bf16.mxu1 %v2965_v7  ;;  %v2977_v19 = vcombine.high %v3490_v8, %v3493_v9  ;;  %v617_v20 = vunpack.c.l.bf16 %v3508_v16  ;;  %v618_v24 = vunpack.c.h.bf16 %v3508_v16 }
  0x51   : > { %2968 = vmatmul.mubr.msk.bf16.vlgmr.msra.gmra.mxu1 %vm1050_vm0, %v3462_v58  ;;  %1178 = vmatpush1.bf16.msra.mxu0 %v2962_v10  ;;  %v647_v17 = vmul.f32 %v615_v12, %v615_v12  ;;  %v3510_v18 = vadd.f32 %v687_v35, %v615_v12  ;;  %v648_v21 = vmul.f32 %v616_v13, %v616_v13  ;;  %v625_v35 = vunpack.c.l.bf16 %v3535_v30 }
  0x52   : > { %1231 = vmatpush1.bf16.msra.mxu1 %v2964_v11  ;;  %1099 = vmatprep.mubr.bf16.mxu0 %v3248_v32  ;;  %v655_v22 = vmul.f32 %v623_v14, %v623_v14  ;;  %v656_v23 = vmul.f32 %v624_v15, %v624_v15  ;;  %v3524_v26 = vadd.f32 %v3413_v36, %v616_v13  ;;  %v626_v36 = vunpack.c.h.bf16 %v3535_v30  ;;  %v3604_v13 = vld [vmem:[%s3487_s14 + $0x18] sm:$0xff] }
  0x53   : > { %1152 = vmatprep.mubr.bf16.mxu1 %v3248_v32  ;;  %v3527_v27 = vadd.f32 %v3415_v37, %v623_v14  ;;  %v3530_v28 = vadd.f32 %v3417_v38, %v624_v15  ;;  %v3532_v29 = vadd.f32 %v719_v45, %v647_v17  ;;  %1339 = vmatprep.subr.bf16.mxu0 %v2977_v19  ;;  %v2149_v15 = vld [vmem:[%s4408_s6 + $0x10] sm:$0xff]  ;;  %v622_v19 = vunpack.c.h.bf16 %v3604_v13 }
  0x54   : > { %v3538_v31 = vadd.f32 %v3429_v46, %v648_v21  ;;  %v3541_v33 = vadd.f32 %v3433_v47, %v655_v22  ;;  %v3544_v34 = vadd.f32 %v3437_v48, %v656_v23  ;;  %v649_v37 = vmul.f32 %v617_v20, %v617_v20  ;;  %v3563_v48 = vld [vmem:[%s3487_s14 + $0x10] sm:$0xff]  ;;  %2153 = vperm.xlu1 %3097, %v2147_v57  }
  0x55   : > { %v650_v38 = vmul.f32 %v618_v24, %v618_v24  ;;  %v3549_v39 = vadd.f32 %v3421_v42, %v617_v20  ;;  %v657_v41 = vmul.f32 %v625_v35, %v625_v35  ;;  %v3555_v45 = vadd.f32 %v3423_v43, %v618_v24  ;;  %2168 = vperm.xlu0 %3096, %v2150_v2  }
  0x56   : > { %v3558_v46 = vadd.f32 %v3425_v44, %v625_v35  ;;  %v2979_v47 = vcombine.high %v3508_v16, %v3535_v30  ;;  %v658_v42 = vmul.f32 %v626_v36, %v626_v36  ;;  %v3568_v55 = vadd.f32 %v3439_v49, %v626_v36  ;;  %v3577_v44 = vld [vmem:[%s3487_s14 + $0x30] sm:$0xff] }
  0x57   : > { %v3571_v56 = vadd.f32 %v3443_v50, %v649_v37  ;;  %v3574_v43 = vadd.f32 %v3447_v51, %v650_v38  ;;  %v3589_v49 = vadd.f32 %v3451_v52, %v657_v41  ;;  %v2976_v50 = vcombine.low %v3490_v8, %v3493_v9 }
  0x58   : > { %2967 = vmatmul.mubr.msk.bf16.gmra.mxu0 %vm1050_vm0, %v3521_v25  ;;  %v2978_v51 = vcombine.low %v3508_v16, %v3535_v30  ;;  %v619_v7 = vunpack.c.l.bf16 %v3563_v48  ;;  %v3598_v10 = vadd.f32 %v3470_v61, %v658_v42  ;;  %1392 = vmatprep.subr.bf16.mxu1 %v2979_v47  ;;  %v620_v11 = vunpack.c.h.bf16 %v3563_v48 }
  0x59   : > { %2969 = vmatmul.mubr.msk.bf16.gmra.mxu1 %vm1050_vm0, %v3521_v25  ;;  %1195 = vmatprep.mubr.bf16.mxu0 %v3248_v32  ;;  %v627_v52 = vunpack.c.l.bf16 %v3577_v44  ;;  %v628_v12 = vunpack.c.h.bf16 %v3577_v44  ;;  %v2981_v9 = vcombine.high %v3563_v48, %v3577_v44  ;;  %v621_v61 = vunpack.c.l.bf16 %v3604_v13 }
  0x5a   : > { %1248 = vmatprep.mubr.bf16.mxu1 %v3248_v32  ;;  %v3608_v8 = vadd.f32 %v691_v59, %v619_v7  ;;  %v3615_v14 = vadd.f32 %v692_v62, %v620_v11  ;;  %v2238_v59 = vld [vmem:[%s4410_s8 + $0x8] sm:$0xff]  ;;  %3212 = vmul.bf16.f32.vacc3 %v3563_v48, %v3563_v48  ;;  %v3636_v62 = vld [vmem:[%s3487_s14 + $0x38] sm:$0xff]  ;;  %3192 = vmul.bf16.f32.vacc2 %v3577_v44, %v3577_v44  ;;  %s3662_s14 = scalar_lea.vmem [#allocation5], %s3402_s25 }
  0x5b   : > { %v3625_v16 = vadd.f32 %v699_v63, %v627_v52  ;;  %v3629_v17 = vadd.f32 %v700_v0, %v628_v12  ;;  %3213 = vmac.bf16.f32.vacc3 %v3454_v53, %v3454_v53  ;;  %3193 = vmac.bf16.f32.vacc2 %v3457_v54, %v3457_v54  ;;  %2163 = vperm.xlu0 %3096, %v2149_v15   ;;  %v3709_v47 = vld [vmem:[%s3662_s14 + $0x8] sm:$0xff]  ;;  %v3738_v7 = vld [vmem:[%s3662_s14 + $0x10] sm:$0xff] }
  0x5c   : > { %v629_v63 = vunpack.c.l.bf16 %v3636_v62  ;;  %v630_v0 = vunpack.c.h.bf16 %v3636_v62  ;;  %v3647_v20 = vadd.f32 %v693_v3, %v621_v61  ;;  %2246 = vperm.xlu1 %3097, %v2238_v59   ;;  %v3653_v53 = vadd.f32 %v694_v4, %v622_v19  ;;  %v3665_v3 = vld [vmem:[%s3662_s14] sm:$0xff]  ;;  %v3718_v42 = vld [vmem:[%s3662_s14 + $0x28] sm:$0xff]  ;;  %v3768_v15 = vld [vmem:[%s3662_s14 + $0x30] sm:$0xff] }
  0x5d   : > { %v2983_v21 = vcombine.high %v3604_v13, %v3636_v62  ;;  %3172 = vmul.bf16.f32.vacc1 %v3604_v13, %v3604_v13  ;;  %3152 = vmul.bf16.f32.vacc0 %v3636_v62, %v3636_v62  ;;  %v762_v2 = vunpack.c.h.bf16 %v3709_v47 }
  0x5e   : > { %v3657_v54 = vadd.f32 %v701_v5, %v629_v63  ;;  %v3671_v4 = vadd.f32 %v702_v6, %v630_v0  ;;  %3173 = vmac.bf16.f32.vacc1 %v3466_v60, %v3466_v60  ;;  %v759_v5 = vunpack.c.l.bf16 %v3665_v3  ;;  %v2237_v60 = vld [vmem:[%s4410_s8] sm:$0xff] }
  0x5f   : > { %3153 = vmac.bf16.f32.vacc0 %v3476_v1, %v3476_v1  ;;  %v760_v6 = vunpack.c.h.bf16 %v3665_v3  ;;  %v2581_v1 = vld [vmem:[%s4411_s9 + $0x8] sm:$0xff]  ;;  %2241 = vperm.xlu0 %3096, %v2237_v60   ;;  %v763_v11 = vunpack.c.l.bf16 %v3738_v7  ;;  %3214 = vmac.bf16.f32.vacc3 %v3738_v7, %v3738_v7 }
  0x60   : > { %2970 = vmatmul.mubr.msk.bf16.vlgmr.msra.gmra.mxu0 %vm1050_vm0, %v3462_v58  ;;  %v3697_v24 = vadd.f32 %v759_v5, %v3510_v18  ;;  %v791_v35 = vmul.f32 %v759_v5, %v759_v5  ;;  %2589 = vperm.xlu1 %3097, %v2581_v1   ;;  %3194 = vmac.bf16.f32.vacc2 %v3768_v15, %v3768_v15 }
  0x61   : > { %2972 = vmatmul.mubr.msk.bf16.vlgmr.msra.gmra.mxu1 %vm1050_vm0, %v3462_v58  ;;  %1340 = vmatpush1.bf16.msra.mxu0 %v2976_v50  ;;  %v3684_v58 = vld [vmem:[%s3662_s14 + $0x20] sm:$0xff]  ;;  %v3700_v30 = vadd.f32 %v760_v6, %v3524_v26  ;;  %v792_v36 = vmul.f32 %v760_v6, %v760_v6  ;;  %v769_v50 = vunpack.c.l.bf16 %v3718_v42  ;;  %v3785_v19 = vadd.f32 %v763_v11, %v3608_v8  ;;  %v3804_v8 = vld [vmem:[%s3662_s14 + $0x38] sm:$0xff] }
  0x62   : > { %1393 = vmatpush1.bf16.msra.mxu1 %v2978_v51  ;;  %1205 = vmatprep.mubr.bf16.mxu0 %v3248_v32  ;;  %v767_v22 = vunpack.c.l.bf16 %v3684_v58  ;;  %v768_v23 = vunpack.c.h.bf16 %v3684_v58  ;;  %v3712_v18 = vadd.f32 %v791_v35, %v3532_v29  ;;  %v2980_v29 = vcombine.low %v3563_v48, %v3577_v44 }
  0x63   : > { %1258 = vmatprep.mubr.bf16.mxu1 %v3248_v32  ;;  %1445 = vmatprep.subr.bf16.mxu0 %v2981_v9  ;;  %v3715_v26 = vadd.f32 %v792_v36, %v3538_v31  ;;  %v770_v31 = vunpack.c.h.bf16 %v3718_v42  ;;  %v3747_v48 = vadd.f32 %v762_v2, %v3555_v45  ;;  %v3750_v44 = vadd.f32 %v769_v50, %v3558_v46  ;;  %v3841_v36 = vld [vmem:[%s4407_s5 + $0x8] sm:$0xff]  }
  0x64   : > { %1498 = vmatprep.subr.bf16.mxu1 %v2983_v21  ;;  %v3703_v37 = vadd.f32 %v767_v22, %v3527_v27  ;;  %v3706_v38 = vadd.f32 %v768_v23, %v3530_v28  ;;  %v799_v40 = vmul.f32 %v767_v22, %v767_v22  ;;  %v800_v41 = vmul.f32 %v768_v23, %v768_v23  ;;  %v3797_v21 = vld [vmem:[%s3662_s14 + $0x18] sm:$0xff]  ;;  %s3820_s14 = scalar_lea.vmem [#allocation6], %s3402_s25  ;;  %s2950_s25 = sshll.u32 %s3399_s28, 3 }
  0x65   : > { %v761_v27 = vunpack.c.l.bf16 %v3709_v47  ;;  %v3755_v52 = vadd.f32 %v770_v31, %v3568_v55  ;;  %v801_v12 = vmul.f32 %v769_v50, %v769_v50  ;;  %v802_v9 = vmul.f32 %v770_v31, %v770_v31  ;;  %v3823_v60 = vld [vmem:[%s3820_s14] sm:$0xff]  ;;  %s595_s26 = scalar_lea.vmem [#allocation7], %s2950_s25 }
  0x66   : > { %v3722_v28 = vadd.f32 %v799_v40, %v3541_v33  ;;  %v3725_v57 = vadd.f32 %v800_v41, %v3544_v34  ;;  %v2580_v34 = vld [vmem:[%s4411_s9] sm:$0xff]  ;;  %v2982_v45 = vcombine.low %v3604_v13, %v3636_v62  ;;  %v2999_v46 = vcombine.high %v3665_v3, %v3684_v58  ;;  %s2802_s12 = sshll.u32 %s595_s26, 4  ;;  %s2803_s12 = int_to_ptr.vmem [resolvable:$true] %s2802_s12 }
  0x67   : > { %v3735_v51 = vadd.f32 %v761_v27, %v3549_v39  ;;  %v793_v33 = vmul.f32 %v761_v27, %v761_v27  ;;  %v794_v39 = vmul.f32 %v762_v2, %v762_v2  ;;  %v764_v55 = vunpack.c.h.bf16 %v3738_v7  ;;  %2584 = vperm.xlu0 %3096, %v2580_v34   ;;  %s3106_s18 = scalar_lea.vmem %s2803_s12, 128 }
  0x68   : > { %2971 = vmatmul.mubr.msk.bf16.gmra.mxu0 %vm1050_vm0, %v3521_v25  ;;  %v3777_v59 = vadd.f32 %v801_v12, %v3589_v49  ;;  %v3780_v13 = vadd.f32 %v802_v9, %v3598_v10  ;;  %v772_v62 = vunpack.c.h.bf16 %v3768_v15  ;;  %v3001_v10 = vcombine.high %v3709_v47, %v3718_v42  ;;  %v3861_v12 = vld [vmem:[%s3820_s14 + $0x8] sm:$0xff]  ;;  %p3107_p0 = scmp.ne.s32.totalorder %s2803_s12, %s3106_s18 }
  0x69   : > { %2973 = vmatmul.mubr.msk.bf16.gmra.mxu1 %vm1050_vm0, %v3521_v25  ;;  %1357 = vmatprep.mubr.bf16.mxu0 %v3248_v32  ;;  %v3758_v25 = vadd.f32 %v793_v33, %v3571_v56  ;;  %v3765_v61 = vadd.f32 %v794_v39, %v3574_v43  ;;  %v3774_v56 = vld [vmem:[%s4407_s5] sm:$0xff]   ;;  %v771_v43 = vunpack.c.l.bf16 %v3768_v15  ;;  %v3788_v63 = vadd.f32 %v764_v55, %v3615_v14  ;;  %v3873_v55 = vld [vmem:[%s3820_s14 + $0x28] sm:$0xff] }
  0x6a   : > { %1410 = vmatprep.mubr.bf16.mxu1 %v3248_v32  ;;  %v3794_v49 = vadd.f32 %v772_v62, %v3629_v17  ;;  %v765_v14 = vunpack.c.l.bf16 %v3797_v21  ;;  %v773_v17 = vunpack.c.l.bf16 %v3804_v8  ;;  %v774_v5 = vunpack.c.h.bf16 %v3804_v8  ;;  %p3108_p1 = pnand %p3107_p0, %p3359_p6 }
  0x6b   : > { %v3791_v0 = vadd.f32 %v771_v43, %v3625_v16  ;;  %v766_v16 = vunpack.c.h.bf16 %v3797_v21  ;;  %v831_v1 = vunpack.c.l.bf16 %v3823_v60  ;;  %v832_v35 = vunpack.c.h.bf16 %v3823_v60 }
  0x6c   : > { %v3817_v6 = vadd.f32 %v765_v14, %v3647_v20  ;;  %v3830_v23 = vadd.f32 %v773_v17, %v3657_v54  ;;  %v3835_v20 = vadd.f32 %v774_v5, %v3671_v4  ;;  %3174 = vmac.bf16.f32.vacc1 %v3797_v21, %v3797_v21  ;;  %p3109_p2 = pneg %p3108_p1 }
  0x6d   : > { %v3827_v22 = vadd.f32 %v766_v16, %v3653_v53  ;;  %v3846_v53 = vld [vmem:[%s3820_s14 + $0x20] sm:$0xff]  ;;  %3154 = vmac.bf16.f32.vacc0 %v3804_v8, %v3804_v8  ;;  %v847_v40 = vadd.f32 %v831_v1, %v3697_v24  ;;  %v848_v41 = vadd.f32 %v832_v35, %v3700_v30 }
  0x6e   : > { %v839_v54 = vunpack.c.l.bf16 %v3846_v53  ;;  %v840_v4 = vunpack.c.h.bf16 %v3846_v53  ;;  %v863_v27 = vmul.f32 %v831_v1, %v831_v1  ;;  %v864_v2 = vmul.f32 %v832_v35, %v832_v35 }
  0x6f   : > { %v895_v11 = vmul.f32 %v847_v40, %v847_v40  ;;  %v896_v24 = vmul.f32 %v848_v41, %v848_v41  ;;  %v833_v9 = vunpack.c.l.bf16 %v3861_v12  ;;  %v834_v62 = vunpack.c.h.bf16 %v3861_v12 }
  0x70   : > { %2984 = vmatmul.mubr.msk.bf16.vlgmr.msra.gmra.mxu0 %vm1050_vm0, %v3774_v56  ;;  %v855_v50 = vadd.f32 %v839_v54, %v3703_v37  ;;  %v871_v31 = vmul.f32 %v839_v54, %v839_v54  ;;  %v872_v33 = vmul.f32 %v840_v4, %v840_v4  ;;  %v879_v34 = vadd.f32 %v863_v27, %v3712_v18 }
  0x71   : > { %2986 = vmatmul.mubr.msk.bf16.vlgmr.msra.gmra.mxu1 %vm1050_vm0, %v3774_v56  ;;  %1446 = vmatpush1.bf16.msra.mxu0 %v2980_v29  ;;  %v856_v29 = vadd.f32 %v840_v4, %v3706_v38  ;;  %v880_v39 = vadd.f32 %v864_v2, %v3715_v26  ;;  %v2998_v18 = vcombine.low %v3665_v3, %v3684_v58  ;;  %v3899_v2 = vld [vmem:[%s3820_s14 + $0x10] sm:$0xff] }
  0x72   : > { %1499 = vmatpush1.bf16.msra.mxu1 %v2982_v45  ;;  %1367 = vmatprep.mubr.bf16.mxu0 %v3248_v32  ;;  %v887_v30 = vadd.f32 %v871_v31, %v3722_v28  ;;  %v888_v37 = vadd.f32 %v872_v33, %v3725_v57  ;;  %v903_v38 = vmul.f32 %v855_v50, %v855_v50  ;;  %v841_v28 = vunpack.c.l.bf16 %v3873_v55 }
  0x73   : > { %1420 = vmatprep.mubr.bf16.mxu1 %v3248_v32  ;;  %1612 = vmatprep.subr.bf16.mxu0 %v2999_v46  ;;  %v904_v26 = vmul.f32 %v856_v29, %v856_v29  ;;  %v911_v45 = vsub.f32 %v895_v11, %v879_v34  ;;  %v912_v46 = vsub.f32 %v896_v24, %v880_v39  ;;  %v842_v57 = vunpack.c.h.bf16 %v3873_v55  ;;  %v3908_v34 = vld [vmem:[%s3820_s14 + $0x30] sm:$0xff] }
  0x74   : > { %1665 = vmatprep.subr.bf16.mxu1 %v3001_v10  ;;  %v919_v43 = vsub.f32 %v903_v38, %v887_v30  ;;  %v3000_v10 = vcombine.low %v3709_v47, %v3718_v42  ;;  %v849_v16 = vadd.f32 %v833_v9, %v3735_v51  ;;  %v865_v17 = vmul.f32 %v833_v9, %v833_v9 }
  0x75   : > { %v920_v14 = vsub.f32 %v904_v26, %v888_v37  ;;  %v850_v58 = vadd.f32 %v834_v62, %v3747_v48  ;;  %v857_v5 = vadd.f32 %v841_v28, %v3750_v44  ;;  %v858_v1 = vadd.f32 %v842_v57, %v3755_v52 }
  0x76   : > { %v3881_v3 = vadd.f32 %v919_v43, %v911_v45  ;;  %v866_v54 = vmul.f32 %v834_v62, %v834_v62  ;;  %v873_v4 = vmul.f32 %v841_v28, %v841_v28  ;;  %v874_v40 = vmul.f32 %v842_v57, %v842_v57 }
  0x77   : > { %v3886_v35 = vadd.f32 %v920_v14, %v912_v46  ;;  %v3003_v47 = vcombine.high %v3738_v7, %v3768_v15  ;;  %v881_v42 = vadd.f32 %v865_v17, %v3758_v25  ;;  %v897_v51 = vmul.f32 %v849_v16, %v849_v16  ;;  %v3928_v16 = vld [vmem:[%s3820_s14 + $0x18] sm:$0xff] }
  0x78   : > { %2985 = vmatmul.mubr.msk.bf16.gmra.mxu0 %vm1050_vm0, %v3841_v36  ;;  %4430 = vst [vmem:[#allocation10_spill] sm:$0xff] %v3881_v3  ;;  %v898_v41 = vmul.f32 %v850_v58, %v850_v58  ;;  %v3005_v48 = vcombine.high %v3797_v21, %v3804_v8  ;;  %v882_v44 = vadd.f32 %v866_v54, %v3765_v61  ;;  %v835_v29 = vunpack.c.l.bf16 %v3899_v2 }
  0x79   : > { %2987 = vmatmul.mubr.msk.bf16.gmra.mxu1 %vm1050_vm0, %v3841_v36  ;;  %1463 = vmatprep.mubr.bf16.mxu0 %v3248_v32  ;;  %4431 = vst [vmem:[#allocation11_spill] sm:$0xff] %v3886_v35  ;;  %v889_v52 = vadd.f32 %v873_v4, %v3777_v59  ;;  %v890_v27 = vadd.f32 %v874_v40, %v3780_v13  ;;  %v836_v59 = vunpack.c.h.bf16 %v3899_v2  ;;  %v844_v39 = vunpack.c.h.bf16 %v3908_v34 }
  0x7a   : > { %1516 = vmatprep.mubr.bf16.mxu1 %v3248_v32  ;;  %v905_v25 = vmul.f32 %v857_v5, %v857_v5  ;;  %v906_v50 = vmul.f32 %v858_v1, %v858_v1  ;;  %v913_v31 = vsub.f32 %v897_v51, %v881_v42  ;;  %v914_v61 = vsub.f32 %v898_v41, %v882_v44  ;;  %v3942_v44 = vld [vmem:[%s3820_s14 + $0x38] sm:$0xff]  ;;  %s603_s14 = scalar_lea.vmem %s4406_s4, %s4501_s13 }
  0x7b   : > { %v851_v30 = vadd.f32 %v835_v29, %v3785_v19  ;;  %v852_v37 = vadd.f32 %v836_v59, %v3788_v63  ;;  %v860_v9 = vadd.f32 %v844_v39, %v3794_v49  ;;  %3215 = vmac.bf16.f32.vacc3 %v3899_v2, %v3899_v2 }
  0x7c   : > { %v921_v13 = vsub.f32 %v905_v25, %v889_v52  ;;  %v922_v33 = vsub.f32 %v906_v50, %v890_v27  ;;  %v3249_v43 = vmov 1935823168   ;;  %v3222_v28 = vlaneseq  ;;  %v3102_v52 = vld [vmem:[%s4407_s5 + $0x20] sm:$0xff]  }
  0x7d   : > { %v3217_v26 = vmovacc.add.high.vacc3  ;;  %v3220_v62 = vunpack.c.l.s4 %v3249_v43  ;;  %v900_v14 = vmul.f32 %v852_v37, %v852_v37  ;;  %3195 = vmac.bf16.f32.vacc2 %v3908_v34, %v3908_v34 }
  0x7e   : > { %v3912_v11 = vadd.f32 %v921_v13, %v913_v31  ;;  %v3914_v24 = vadd.f32 %v922_v33, %v914_v61  ;;  %v3924_v63 = vshrl.u32 %v3222_v28, 7  ;;  %v837_v40 = vunpack.c.l.bf16 %v3928_v16  ;;  %v3103_v28 = vld [vmem:[%s4407_s5 + $0x28] sm:$0xff]  }
  0x7f   : > { %v3221_v19 = vunpack.c.0.s8 %v3220_v62  ;;  %v3196_v17 = vmovacc.add.low.vacc2  ;;  %v908_v42 = vmul.f32 %v860_v9, %v860_v9  ;;  %v3004_v41 = vcombine.low %v3797_v21, %v3804_v8 }
  0x80   : > { %2988 = vmatmul.mubr.msk.bf16.vlgmr.msra.gmra.mxu0 %vm1050_vm0, %v3774_v56  ;;  %4432 = vst [vmem:[#allocation12_spill] sm:$0xff] %v3912_v11  ;;  %4433 = vst [vmem:[#allocation13_spill] sm:$0xff] %v3914_v24  ;;  %v3197_v58 = vmovacc.add.high.vacc2  ;;  %v838_v50 = vunpack.c.h.bf16 %v3928_v16  ;;  %v845_v29 = vunpack.c.l.bf16 %v3942_v44  ;;  %v3021_v31 = vcombine.high %v3823_v60, %v3846_v53 }
  0x81   : > { %2990 = vmatmul.mubr.msk.bf16.vlgmr.msra.gmra.mxu1 %vm1050_vm0, %v3774_v56  ;;  %1613 = vmatpush1.bf16.msra.mxu0 %v2998_v18  ;;  %v843_v56 = vunpack.c.l.bf16 %v3908_v34  ;;  %v3216_v18 = vmovacc.add.low.vacc3  ;;  %4434 = vst [vmem:[#allocation14_spill] sm:$0xff] %v3924_v63  ;;  %v3023_v33 = vcombine.high %v3861_v12, %v3873_v55  ;;  %3175 = vmac.bf16.f32.vacc1 %v3928_v16, %v3928_v16 }
  0x82   : > { %1666 = vmatpush1.bf16.msra.mxu1 %v3000_v10  ;;  %1473 = vmatprep.mubr.bf16.mxu0 %v3248_v32  ;;  %v899_v10 = vmul.f32 %v851_v30, %v851_v30  ;;  %v3198_v5 = vcombine.low %v3196_v17, %v3197_v58  ;;  %v3199_v1 = vcombine.high %v3196_v17, %v3197_v58 }
  0x83   : > { %1526 = vmatprep.mubr.bf16.mxu1 %v3248_v32  ;;  %1718 = vmatprep.subr.bf16.mxu0 %v3003_v47  ;;  %v859_v38 = vadd.f32 %v843_v56, %v3791_v0  ;;  %v3218_v45 = vcombine.low %v3216_v18, %v3217_v26  ;;  %v3219_v46 = vcombine.high %v3216_v18, %v3217_v26  ;;  %v3176_v56 = vmovacc.add.low.vacc1 }
  0x84   : > { %1771 = vmatprep.subr.bf16.mxu1 %v3005_v48  ;;  %v3224_v0 = vsub.s32 %v3221_v19, %v3924_v63  ;;  %v854_v61 = vadd.f32 %v838_v50, %v3827_v22  ;;  %v861_v59 = vadd.f32 %v845_v29, %v3830_v23  ;;  %3155 = vmac.bf16.f32.vacc0 %v3942_v44, %v3942_v44 }
  0x85   : > { %v907_v47 = vmul.f32 %v859_v38, %v859_v38  ;;  %v3020_v17 = vcombine.low %v3823_v60, %v3846_v53  ;;  %v3022_v58 = vcombine.low %v3861_v12, %v3873_v55  ;;  %v3104_v60 = vld [vmem:[%s4407_s5 + $0x30] sm:$0xff]   ;;  %v3024_v53 = vcombine.low %v3899_v2, %v3908_v34  ;;  %v3105_v55 = vld [vmem:[%s4407_s5 + $0x38] sm:$0xff]  }
  0x86   : > { %v3225_v49 = vrot.slane %v3218_v45, %v3224_v0  ;;  %v3231_v57 = vrot.slane %v3219_v46, %v3224_v0  ;;  %v3205_v54 = vrot.slane %v3198_v5, %v3224_v0  ;;  %v3211_v4 = vrot.slane %v3199_v1, %v3224_v0 }
  0x87   : > { %v3156_v22 = vmovacc.add.low.vacc0  ;;  %v902_v46 = vmul.f32 %v854_v61, %v854_v61  ;;  %v909_v43 = vmul.f32 %v861_v59, %v861_v59  ;;  %v3025_v5 = vcombine.high %v3899_v2, %v3908_v34 }
  0x88   : > { %2989 = vmatmul.mubr.msk.bf16.gmra.mxu0 %vm1050_vm0, %v3841_v36  ;;  %v915_v51 = vsub.f32 %v899_v10, %v3225_v49  ;;  %v916_v48 = vsub.f32 %v900_v14, %v3231_v57  ;;  %v923_v27 = vsub.f32 %v907_v47, %v3205_v54  ;;  %v924_v25 = vsub.f32 %v908_v42, %v3211_v4 }
  0x89   : > { %2991 = vmatmul.mubr.msk.bf16.gmra.mxu1 %vm1050_vm0, %v3841_v36  ;;  %1630 = vmatprep.mubr.bf16.mxu0 %v3248_v32  ;;  %v3002_v36 = vcombine.low %v3738_v7, %v3768_v15  ;;  %v846_v7 = vunpack.c.h.bf16 %v3942_v44  ;;  %v853_v15 = vadd.f32 %v837_v40, %v3817_v6  ;;  %v3177_v6 = vmovacc.add.high.vacc1 }
  0x8a   : > { %1683 = vmatprep.mubr.bf16.mxu1 %v3248_v32  ;;  %v3953_v21 = vadd.f32 %v923_v27, %v915_v51  ;;  %v3955_v8 = vadd.f32 %v924_v25, %v916_v48  ;;  %v3157_v23 = vmovacc.add.high.vacc0  ;;  %v3027_v1 = vcombine.high %v3928_v16, %v3942_v44 }
  0x8b   : > { %v862_v13 = vadd.f32 %v846_v7, %v3835_v20  ;;  %v3178_v39 = vcombine.low %v3176_v56, %v3177_v6  ;;  %v3179_v30 = vcombine.high %v3176_v56, %v3177_v6  ;;  %v901_v9 = vmul.f32 %v853_v15, %v853_v15 }
  0x8c   : > { %4435 = vst [vmem:[#allocation15_spill] sm:$0xff] %v3953_v21  ;;  %4436 = vst [vmem:[#allocation16_spill] sm:$0xff] %v3955_v8  ;;  %v3158_v20 = vcombine.low %v3156_v22, %v3157_v23  ;;  %v3159_v18 = vcombine.high %v3156_v22, %v3157_v23  ;;  %v3026_v12 = vcombine.low %v3928_v16, %v3942_v44  ;;  %v4414_v2 = vmov 0.0  }
  0x8d   : > { %v3185_v37 = vrot.slane %v3178_v39, %v3224_v0  ;;  %v3191_v38 = vrot.slane %v3179_v30, %v3224_v0  ;;  %v910_v62 = vmul.f32 %v862_v13, %v862_v13 }
  0x8e   : > { %v3165_v26 = vrot.slane %v3158_v20, %v3224_v0  ;;  %v3171_v45 = vrot.slane %v3159_v18, %v3224_v0 }
  0x8f   : > { %v917_v19 = vsub.f32 %v901_v9, %v3185_v37  ;;  %v918_v49 = vsub.f32 %v902_v46, %v3191_v38 }
  0x90   : > { %3006 = vmatmul.mubr.msk.bf16.vlgmr.msra.gmra.mxu0 %vm1050_vm0, %v3102_v52  ;;  %v925_v57 = vsub.f32 %v909_v43, %v3165_v26  ;;  %v926_v10 = vsub.f32 %v910_v62, %v3171_v45 }
  0x91   : > { %3008 = vmatmul.mubr.msk.bf16.vlgmr.msra.gmra.mxu1 %vm1050_vm0, %v3102_v52  ;;  %1719 = vmatpush1.bf16.msra.mxu0 %v3002_v36 }
  0x92   : > { %1772 = vmatpush1.bf16.msra.mxu1 %v3004_v41  ;;  %1640 = vmatprep.mubr.bf16.mxu0 %v3248_v32  ;;  %v3973_v14 = vadd.f32 %v925_v57, %v917_v19  ;;  %v3975_v0 = vadd.f32 %v926_v10, %v918_v49 }
  0x93   : > { %1693 = vmatprep.mubr.bf16.mxu1 %v3248_v32  ;;  %1917 = vmatprep.subr.bf16.mxu0 %v3021_v31 }
  0x94   : > { %1970 = vmatprep.subr.bf16.mxu1 %v3023_v33  ;;  %4437 = vst [vmem:[#allocation17_spill] sm:$0xff] %v3973_v14  ;;  %4438 = vst [vmem:[#allocation18_spill] sm:$0xff] %v3975_v0 }
  0x98   : > { %3007 = vmatmul.mubr.msk.bf16.gmra.mxu0 %vm1050_vm0, %v3103_v28 }
  0x99   : > { %3009 = vmatmul.mubr.msk.bf16.gmra.mxu1 %vm1050_vm0, %v3103_v28  ;;  %1736 = vmatprep.mubr.bf16.mxu0 %v3248_v32 }
  0x9a   : > { %1789 = vmatprep.mubr.bf16.mxu1 %v3248_v32 }
  0xa0   : > { %3010 = vmatmul.mubr.msk.bf16.vlgmr.msra.gmra.mxu0 %vm1050_vm0, %v3102_v52 }
  0xa1   : > { %3012 = vmatmul.mubr.msk.bf16.vlgmr.msra.gmra.mxu1 %vm1050_vm0, %v3102_v52  ;;  %1918 = vmatpush1.bf16.msra.mxu0 %v3020_v17 }
  0xa2   : > { %1971 = vmatpush1.bf16.msra.mxu1 %v3022_v58  ;;  %1746 = vmatprep.mubr.bf16.mxu0 %v3248_v32 }
  0xa3   : > { %1799 = vmatprep.mubr.bf16.mxu1 %v3248_v32  ;;  %2023 = vmatprep.subr.bf16.mxu0 %v3025_v5 }
  0xa4   : > { %2076 = vmatprep.subr.bf16.mxu1 %v3027_v1 }
  0xa8   : > { %3011 = vmatmul.mubr.msk.bf16.gmra.mxu0 %vm1050_vm0, %v3103_v28 }
  0xa9   : > { %3013 = vmatmul.mubr.msk.bf16.gmra.mxu1 %vm1050_vm0, %v3103_v28  ;;  %1935 = vmatprep.mubr.bf16.mxu0 %v3248_v32 }
  0xaa   : > { %1988 = vmatprep.mubr.bf16.mxu1 %v3248_v32 }
  0xb0   : > { %3028 = vmatmul.mubr.msk.bf16.vlgmr.msra.gmra.mxu0 %vm1050_vm0, %v3104_v60 }
  0xb1   : > { %3030 = vmatmul.mubr.msk.bf16.vlgmr.msra.gmra.mxu1 %vm1050_vm0, %v3104_v60  ;;  %2024 = vmatpush1.bf16.msra.mxu0 %v3024_v53 }
  0xb2   : > { %2077 = vmatpush1.bf16.msra.mxu1 %v3026_v12  ;;  %1945 = vmatprep.mubr.bf16.mxu0 %v3248_v32 }
  0xb3   : > { %1998 = vmatprep.mubr.bf16.mxu1 %v3248_v32 }
  0xb8   : > { %3029 = vmatmul.mubr.msk.bf16.gmra.mxu0 %vm1050_vm0, %v3105_v55 }
  0xb9   : > { %3031 = vmatmul.mubr.msk.bf16.gmra.mxu1 %vm1050_vm0, %v3105_v55  ;;  %2041 = vmatprep.mubr.bf16.mxu0 %v3248_v32 }
  0xba   : > { %2094 = vmatprep.mubr.bf16.mxu1 %v3248_v32 }
  0xc0   : > { %3032 = vmatmul.mubr.msk.bf16.vlgmr.msra.gmra.mxu0 %vm1050_vm0, %v3104_v60 }
  0xc1   : > { %3034 = vmatmul.mubr.msk.bf16.vlgmr.msra.gmra.mxu1 %vm1050_vm0, %v3104_v60  ;;  %2051 = vmatprep.mubr.bf16.mxu0 %v3248_v32 }
  0xc2   : > { %2104 = vmatprep.mubr.bf16.mxu1 %v3248_v32 }
  0xc8   : > { %3033 = vmatmul.mubr.msk.bf16.gmra.mxu0 %vm1050_vm0, %v3105_v55 }
  0xc9   : > { %3035 = vmatmul.mubr.msk.bf16.gmra.mxu1 %vm1050_vm0, %v3105_v55  ;;  %2320 = vmatprep.mubr.f32.mxu0 %v4414_v2 }
  0xca   : > { %2397 = vmatprep.mubr.f32.mxu1 %v4414_v2 }
 0x110   : > { %v1091_v34 = vpop.f32.mrf.mxu0 }
 0x111   : > { %v1144_v16 = vpop.f32.mrf.mxu1 }
 0x112   : > { %v1093_v54 = vpop.f32.mrf.mxu0 }
 0x113   : > { %v1146_v4 = vpop.f32.mrf.mxu1 }
 0x114   : > { %v1095_v40 = vpop.f32.mrf.mxu0 }
 0x115   : > { %v1148_v47 = vpop.f32.mrf.mxu1 }
 0x116   : > { %v1097_v42 = vpop.f32.mrf.mxu0 }
 0x117   : > { %v1150_v51 = vpop.f32.mrf.mxu1 }
 0x118   : > { %v1101_v36 = vpop.f32.mrf.mxu0 }
 0x119   : > { %v1154_v41 = vpop.f32.mrf.mxu1 }
 0x11a   : > { %v1103_v32 = vpop.f32.mrf.mxu0 }
 0x11b   : > { %v1156_v48 = vpop.f32.mrf.mxu1 }
 0x11c   : > { %v4023_v44 = vpop.f32.mrf.mxu0 }
 0x11d   : > { %v4025_v52 = vpop.f32.mrf.mxu1 }
 0x11e   : > { %v4027_v27 = vpop.f32.mrf.mxu0 }
 0x11f   : > { %v4029_v25 = vpop.f32.mrf.mxu1 }
 0x120   : > { %v1197_v50 = vpop.f32.mrf.mxu0 }
 0x121   : > { %v1250_v29 = vpop.f32.mrf.mxu1 }
 0x122   : > { %v1199_v31 = vpop.f32.mrf.mxu0 }
 0x123   : > { %v1252_v7 = vpop.f32.mrf.mxu1 }
 0x124   : > { %v1201_v15 = vpop.f32.mrf.mxu0 }
 0x125   : > { %v1254_v61 = vpop.f32.mrf.mxu1 }
 0x126   : > { %v1203_v59 = vpop.f32.mrf.mxu0 }
 0x127   : > { %v1256_v13 = vpop.f32.mrf.mxu1 }
 0x128   : > { %v1207_v33 = vpop.f32.mrf.mxu0 }
 0x129   : > { %v1260_v56 = vpop.f32.mrf.mxu1 }
 0x12a   : > { %v1209_v6 = vpop.f32.mrf.mxu0 }
 0x12b   : > { %v1262_v39 = vpop.f32.mrf.mxu1 }
 0x12c   : > { %v4031_v30 = vpop.f32.mrf.mxu0 }
 0x12d   : > { %v4033_v37 = vpop.f32.mrf.mxu1 }
 0x12e   : > { %v4035_v38 = vpop.f32.mrf.mxu0 }
 0x12f   : > { %v4037_v9 = vpop.f32.mrf.mxu1 }
 0x130   : > { %v1359_v22 = vpop.f32.mrf.mxu0 }
 0x131   : > { %v4039_v23 = vadd.f32 %v1359_v22, %v1091_v34  ;;  %v1412_v20 = vpop.f32.mrf.mxu1 }
 0x132   : > { %v4041_v18 = vadd.f32 %v1412_v20, %v1144_v16  ;;  %v1361_v26 = vpop.f32.mrf.mxu0 }
 0x133   : > { %v4043_v45 = vadd.f32 %v1361_v26, %v1093_v54  ;;  %v1414_v46 = vpop.f32.mrf.mxu1 }
 0x134   : > { %v4045_v43 = vadd.f32 %v1414_v46, %v1146_v4  ;;  %v1363_v62 = vpop.f32.mrf.mxu0 }
 0x135   : > { %v4047_v19 = vadd.f32 %v1363_v62, %v1095_v40  ;;  %v1416_v28 = vpop.f32.mrf.mxu1 }
 0x136   : > { %v4049_v49 = vadd.f32 %v1416_v28, %v1148_v47  ;;  %v1365_v57 = vpop.f32.mrf.mxu0 }
 0x137   : > { %v4051_v10 = vadd.f32 %v1365_v57, %v1097_v42  ;;  %v1418_v17 = vpop.f32.mrf.mxu1 }
 0x138   : > { %v4053_v58 = vadd.f32 %v1418_v17, %v1150_v51  ;;  %v1369_v5 = vpop.f32.mrf.mxu0 }
 0x139   : > { %v4055_v1 = vadd.f32 %v1369_v5, %v1101_v36  ;;  %v1422_v60 = vpop.f32.mrf.mxu1 }
 0x13a   : > { %v4057_v53 = vadd.f32 %v1422_v60, %v1154_v41  ;;  %v1371_v12 = vpop.f32.mrf.mxu0 }
 0x13b   : > { %v4059_v55 = vadd.f32 %v1371_v12, %v1103_v32  ;;  %v1424_v34 = vpop.f32.mrf.mxu1 }
 0x13c   : > { %v4061_v16 = vadd.f32 %v1424_v34, %v1156_v48  ;;  %v4063_v54 = vpop.f32.mrf.mxu0 }
 0x13d   : > { %v4065_v4 = vpop.f32.mrf.mxu1 }
 0x13e   : > { %v4067_v40 = vpop.f32.mrf.mxu0 }
 0x13f   : > { %v4069_v47 = vpop.f32.mrf.mxu1 }
 0x140   : > { %v1465_v42 = vpop.f32.mrf.mxu0 }
 0x141   : > { %v4071_v51 = vadd.f32 %v1465_v42, %v1197_v50  ;;  %v1518_v36 = vpop.f32.mrf.mxu1 }
 0x142   : > { %v4073_v41 = vadd.f32 %v1518_v36, %v1250_v29  ;;  %v1467_v22 = vpop.f32.mrf.mxu0 }
 0x143   : > { %v4075_v32 = vadd.f32 %v1467_v22, %v1199_v31  ;;  %v1520_v20 = vpop.f32.mrf.mxu1 }
 0x144   : > { %v4077_v48 = vadd.f32 %v1520_v20, %v1252_v7  ;;  %v1469_v26 = vpop.f32.mrf.mxu0 }
 0x145   : > { %v4079_v46 = vadd.f32 %v1469_v26, %v1201_v15  ;;  %v1522_v62 = vpop.f32.mrf.mxu1 }
 0x146   : > { %4439 = vst [vmem:[#allocation19_spill] sm:$0xff] %v4077_v48  ;;  %v4081_v28 = vadd.f32 %v1522_v62, %v1254_v61  ;;  %v1471_v57 = vpop.f32.mrf.mxu0 }
 0x147   : > { %4440 = vst [vmem:[#allocation20_spill] sm:$0xff] %v4079_v46  ;;  %v4083_v17 = vadd.f32 %v1471_v57, %v1203_v59  ;;  %v1524_v50 = vpop.f32.mrf.mxu1 }
 0x148   : > { %4441 = vst [vmem:[#allocation21_spill] sm:$0xff] %v4081_v28  ;;  %v4085_v5 = vadd.f32 %v1524_v50, %v1256_v13  ;;  %v1475_v29 = vpop.f32.mrf.mxu0 }
 0x149   : > { %4442 = vst [vmem:[#allocation22_spill] sm:$0xff] %v4083_v17  ;;  %v4087_v60 = vadd.f32 %v1475_v29, %v1207_v33  ;;  %v1528_v31 = vpop.f32.mrf.mxu1 }
 0x14a   : > { %4443 = vst [vmem:[#allocation23_spill] sm:$0xff] %v4085_v5  ;;  %v4089_v12 = vadd.f32 %v1528_v31, %v1260_v56  ;;  %v1477_v7 = vpop.f32.mrf.mxu0 }
 0x14b   : > { %4444 = vst [vmem:[#allocation24_spill] sm:$0xff] %v4087_v60  ;;  %v4091_v34 = vadd.f32 %v1477_v7, %v1209_v6  ;;  %v1530_v15 = vpop.f32.mrf.mxu1 }
 0x14c   : > { %4445 = vst [vmem:[#allocation25_spill] sm:$0xff] %v4089_v12  ;;  %v4093_v42 = vadd.f32 %v1530_v15, %v1262_v39  ;;  %v1479_v61 = vpop.f32.mrf.mxu0 }
 0x14d   : > { %4446 = vst [vmem:[#allocation26_spill] sm:$0xff] %v4091_v34  ;;  %v1532_v36 = vpop.f32.mrf.mxu1 }
 0x14e   : > { %4447 = vst [vmem:[#allocation27_spill] sm:$0xff] %v4093_v42  ;;  %v1481_v22 = vpop.f32.mrf.mxu0 }
 0x14f   : > { %v1534_v59 = vpop.f32.mrf.mxu1  ;;  %v4138_v48 = vadd.f32 %v1481_v22, %v4035_v38 }
 0x150   : > { %v1632_v20 = vpop.f32.mrf.mxu0 }
 0x151   : > { %v1685_v26 = vpop.f32.mrf.mxu1 }
 0x152   : > { %v1634_v13 = vpop.f32.mrf.mxu0 }
 0x153   : > { %v1687_v62 = vpop.f32.mrf.mxu1 }
 0x154   : > { %v1636_v57 = vpop.f32.mrf.mxu0 }
 0x155   : > { %v1689_v33 = vpop.f32.mrf.mxu1 }
 0x156   : > { %v1638_v50 = vpop.f32.mrf.mxu0 }
 0x157   : > { %v1691_v29 = vpop.f32.mrf.mxu1 }
 0x158   : > { %v1642_v56 = vpop.f32.mrf.mxu0 }
 0x159   : > { %v1695_v31 = vpop.f32.mrf.mxu1 }
 0x15a   : > { %v1644_v2 = vpop.f32.mrf.mxu0 }
 0x15b   : > { %v1697_v6 = vpop.f32.mrf.mxu1 }
 0x15c   : > { %v1646_v7 = vpop.f32.mrf.mxu0 }
 0x15d   : > { %v1699_v63 = vpop.f32.mrf.mxu1 }
 0x15e   : > { %v1648_v39 = vpop.f32.mrf.mxu0 }
 0x15f   : > { %v1701_v15 = vpop.f32.mrf.mxu1 }
 0x160   : > { %v1738_v0 = vpop.f32.mrf.mxu0 }
 0x161   : > { %v1791_v14 = vpop.f32.mrf.mxu1 }
 0x162   : > { %v1740_v8 = vpop.f32.mrf.mxu0 }
 0x163   : > { %v1793_v21 = vpop.f32.mrf.mxu1 }
 0x164   : > { %v4095_v24 = vpop.f32.mrf.mxu0 }
 0x165   : > { %4448 = vst [vmem:[#allocation28_spill] sm:$0xff] %v4095_v24  ;;  %v4097_v11 = vpop.f32.mrf.mxu1 }
 0x166   : > { %4449 = vst [vmem:[#allocation29_spill] sm:$0xff] %v4097_v11  ;;  %v4099_v35 = vpop.f32.mrf.mxu0 }
 0x167   : > { %4450 = vst [vmem:[#allocation30_spill] sm:$0xff] %v4099_v35  ;;  %v4101_v3 = vpop.f32.mrf.mxu1 }
 0x168   : > { %4451 = vst [vmem:[#allocation31_spill] sm:$0xff] %v4101_v3  ;;  %v4103_v42 = vpop.f32.mrf.mxu0 }
 0x169   : > { %4452 = vst [vmem:[#allocation32_spill] sm:$0xff] %v4103_v42  ;;  %v4105_v34 = vpop.f32.mrf.mxu1 }
 0x16a   : > { %4453 = vst [vmem:[#allocation33_spill] sm:$0xff] %v4105_v34  ;;  %v4107_v12 = vpop.f32.mrf.mxu0 }
 0x16b   : > { %4454 = vst [vmem:[#allocation34_spill] sm:$0xff] %v4107_v12  ;;  %v4109_v60 = vpop.f32.mrf.mxu1  ;;  %v1374_v12 = vadd.f32 %v4063_v54, %v4023_v44  ;;  %v4141_v44 = vadd.f32 %v1534_v59, %v4037_v9  ;;  %v1821_v9 = vadd.f32 %v1691_v29, %v4053_v58 }
 0x16c   : > { %4455 = vst [vmem:[#allocation35_spill] sm:$0xff] %v4109_v60  ;;  %v4111_v5 = vpop.f32.mrf.mxu0 }
 0x16d   : > { %4456 = vst [vmem:[#allocation36_spill] sm:$0xff] %v4111_v5  ;;  %v4113_v17 = vpop.f32.mrf.mxu1  ;;  %v1427_v5 = vadd.f32 %v4065_v4, %v4025_v52  ;;  %v1810_v52 = vadd.f32 %v1632_v20, %v4039_v23  ;;  %v1818_v4 = vadd.f32 %v1636_v57, %v4047_v19  ;;  %v1826_v23 = vadd.f32 %v1642_v56, %v4055_v1 }
 0x16e   : > { %4457 = vst [vmem:[#allocation37_spill] sm:$0xff] %v4113_v17  ;;  %v4115_v28 = vpop.f32.mrf.mxu0  ;;  %v4132_v17 = vadd.f32 %v1479_v61, %v4031_v30  ;;  %v1813_v30 = vadd.f32 %v1687_v62, %v4045_v43  ;;  %v1829_v43 = vadd.f32 %v1697_v6, %v4061_v16  ;;  %v4158_v20 = vadd.f32 %v1738_v0, %v4071_v51 }
 0x16f   : > { %4458 = vst [vmem:[#allocation38_spill] sm:$0xff] %v4115_v28  ;;  %v4117_v24 = vpop.f32.mrf.mxu1  ;;  %v1376_v28 = vadd.f32 %v4067_v40, %v4027_v27  ;;  %v1812_v27 = vadd.f32 %v1685_v26, %v4041_v18  ;;  %v4149_v40 = vpop.permute.xlu0 %2168  ;;  %v1828_v18 = vadd.f32 %v1695_v31, %v4057_v53  ;;  %v1836_v19 = vadd.f32 %v1699_v63, %v1427_v5  ;;  %v4462_v53 = vld [vmem:[#allocation19_spill] sm:$0xff] }
 0x170   : > { %4459 = vst [vmem:[#allocation39_spill] sm:$0xff] %v4117_v24  ;;  %v1937_v11 = vpop.f32.mrf.mxu0  ;;  %v1429_v24 = vadd.f32 %v4069_v47, %v4029_v25  ;;  %v1811_v25 = vadd.f32 %v1634_v13, %v4043_v45  ;;  %v1819_v47 = vadd.f32 %v1638_v50, %v4051_v10  ;;  %v1827_v45 = vadd.f32 %v1644_v2, %v4059_v55  ;;  %v4169_v2 = vpop.permute.xlu1 %2158 }
 0x171   : > { %v4119_v35 = vpop.f32.mrf.mxu1  ;;  %v4161_v10 = vadd.f32 %v1791_v14, %v4073_v41  ;;  %v4164_v1 = vadd.f32 %v1740_v8, %v4075_v32  ;;  %v4167_v26 = vadd.f32 %v1793_v21, %v4462_v53  ;;  %v4466_v53 = vld [vmem:[#allocation28_spill] sm:$0xff] }
 0x172   : > { %4460 = vst [vmem:[#allocation40_spill] sm:$0xff] %v4119_v35  ;;  %v1939_v3 = vpop.f32.mrf.mxu0  ;;  %v4135_v35 = vadd.f32 %v1532_v36, %v4033_v37  ;;  %v1820_v37 = vadd.f32 %v1689_v33, %v4049_v49  ;;  %v1834_v36 = vadd.f32 %v1646_v7, %v1374_v12  ;;  %v1835_v49 = vadd.f32 %v1648_v39, %v1376_v28 }
 0x173   : > { %v4121_v46 = vpop.f32.mrf.mxu1  ;;  %v1837_v59 = vadd.f32 %v1701_v15, %v1429_v24  ;;  %v2115_v28 = vadd.f32 %v1937_v11, %v1810_v52  ;;  %v2116_v12 = vadd.f32 %v1939_v3, %v1811_v25  ;;  %v4171_v41 = vpop.permute.xlu0 %2163 }
 0x174   : > { %4461 = vst [vmem:[#allocation41_spill] sm:$0xff] %v4121_v46  ;;  %v1941_v42 = vpop.f32.mrf.mxu0  ;;  %v4188_v52 = vpop.permute.xlu1 %2153 }
 0x175   : > { %v1994_v34 = vpop.f32.mrf.mxu1  ;;  %v2123_v62 = vadd.f32 %v1941_v42, %v1818_v4 }
 0x176   : > { %v1943_v60 = vpop.f32.mrf.mxu0  ;;  %v2125_v29 = vadd.f32 %v1994_v34, %v1820_v37 }
 0x177   : > { %v1996_v46 = vpop.f32.mrf.mxu1  ;;  %v2124_v14 = vadd.f32 %v1943_v60, %v1819_v47 }
 0x178   : > { %v1947_v54 = vpop.f32.mrf.mxu0  ;;  %v2126_v21 = vadd.f32 %v1996_v46, %v1821_v9 }
 0x179   : > { %v2000_v38 = vpop.f32.mrf.mxu1  ;;  %v2131_v24 = vadd.f32 %v1947_v54, %v1826_v23  ;;  %v4464_v34 = vld [vmem:[#allocation40_spill] sm:$0xff]  ;;  %v2180_v54 = vadd.f32 %v4169_v2, %v2124_v14  ;;  %v4469_v14 = vld [vmem:[#allocation22_spill] sm:$0xff] }
 0x17a   : > { %v1949_v61 = vpop.f32.mrf.mxu0  ;;  %v2133_v13 = vadd.f32 %v2000_v38, %v1828_v18  ;;  %v2117_v15 = vadd.f32 %v4464_v34, %v1812_v27  ;;  %v2182_v38 = vadd.f32 %v4169_v2, %v2126_v21  ;;  %v2172_v18 = vadd.f32 %v4188_v52, %v2116_v12  ;;  %v4471_v21 = vld [vmem:[#allocation23_spill] sm:$0xff]  ;;  %v4477_v34 = vld [vmem:[#allocation26_spill] sm:$0xff] }
 0x17b   : > { %v2002_v22 = vpop.f32.mrf.mxu1  ;;  %v2132_v55 = vadd.f32 %v1949_v61, %v1827_v45  ;;  %v4463_v31 = vld [vmem:[#allocation41_spill] sm:$0xff]  ;;  %v2187_v7 = vadd.f32 %v4171_v41, %v2131_v24  ;;  %v2181_v27 = vadd.f32 %v4169_v2, %v2125_v29  ;;  %v4473_v29 = vld [vmem:[#allocation24_spill] sm:$0xff] }
 0x17c   : > { %v1951_v58 = vpop.f32.mrf.mxu0  ;;  %v2134_v5 = vadd.f32 %v2002_v22, %v1829_v43  ;;  %v2118_v6 = vadd.f32 %v4463_v31, %v1813_v30  ;;  %v2189_v25 = vadd.f32 %v4171_v41, %v2133_v13  ;;  %v2179_v30 = vadd.f32 %v4169_v2, %v2123_v62  ;;  %v4470_v13 = vld [vmem:[#allocation30_spill] sm:$0xff] }
 0x17d   : > { %v2139_v63 = vadd.f32 %v1951_v58, %v1834_v36  ;;  %v2004_v16 = vpop.f32.mrf.mxu1  ;;  %v2188_v11 = vadd.f32 %v4171_v41, %v2132_v55  ;;  %v4465_v58 = vld [vmem:[#allocation20_spill] sm:$0xff]  ;;  %v2214_v62 = vmax.f32 %v2182_v38, 0.0  ;;  %v2213_v31 = vmax.f32 %v2181_v27, 0.0 }
 0x17e   : > { %v2141_v0 = vadd.f32 %v2004_v16, %v1836_v19  ;;  %v1953_v51 = vpop.f32.mrf.mxu0  ;;  %v2190_v46 = vadd.f32 %v4171_v41, %v2134_v5  ;;  %v2174_v36 = vadd.f32 %v4188_v52, %v2118_v6  ;;  %v2219_v19 = vmax.f32 %v2187_v7, 0.0  ;;  %v4475_v7 = vld [vmem:[#allocation25_spill] sm:$0xff]  ;;  %v4222_v38 = vld [vmem:[%s4409_s7] sm:$0xff] }
 0x17f   : > { %v2140_v8 = vadd.f32 %v1953_v51, %v1835_v49  ;;  %v2006_v32 = vpop.f32.mrf.mxu1  ;;  %v2195_v57 = vadd.f32 %v4149_v40, %v2139_v63  ;;  %v2220_v61 = vmax.f32 %v2188_v11, 0.0  ;;  %v1822_v55 = vadd.f32 %v4466_v53, %v4465_v58  ;;  %v4468_v51 = vld [vmem:[#allocation29_spill] sm:$0xff]  ;;  %v4474_v11 = vld [vmem:[#allocation32_spill] sm:$0xff]  ;;  %v4484_v53 = vld [vmem:[#allocation39_spill] sm:$0xff] }
 0x180   : > { %v2142_v33 = vadd.f32 %v2006_v32, %v1837_v59  ;;  %v4174_v50 = vpop.f32.mrf.mxu0  ;;  %v2197_v56 = vadd.f32 %v4149_v40, %v2141_v0  ;;  %v2222_v22 = vmax.f32 %v2190_v46, 0.0  ;;  %v2171_v59 = vadd.f32 %v4188_v52, %v2115_v28  ;;  %v4467_v0 = vld [vmem:[#allocation21_spill] sm:$0xff]  ;;  %v4481_v27 = vld [vmem:[#allocation36_spill] sm:$0xff] }
 0x181   : > { %v2196_v3 = vadd.f32 %v4149_v40, %v2140_v8  ;;  %v4179_v60 = vpop.f32.mrf.mxu1  ;;  %v2227_v47 = vmax.f32 %v2195_v57, 0.0  ;;  %v2212_v63 = vmax.f32 %v2180_v54, 0.0  ;;  %v2221_v16 = vmax.f32 %v2189_v25, 0.0  ;;  %v4472_v57 = vld [vmem:[#allocation31_spill] sm:$0xff]  ;;  %v4476_v46 = vld [vmem:[#allocation33_spill] sm:$0xff] }
 0x182   : > { %v2198_v42 = vadd.f32 %v4149_v40, %v2142_v33  ;;  %v4185_v39 = vpop.f32.mrf.mxu0  ;;  %v2229_v45 = vmax.f32 %v2197_v56, 0.0  ;;  %v2173_v5 = vadd.f32 %v4188_v52, %v2117_v15  ;;  %v1824_v12 = vadd.f32 %v4468_v51, %v4467_v0  ;;  %v4478_v15 = vld [vmem:[#allocation34_spill] sm:$0xff] }
 0x183   : > { %v2228_v4 = vmax.f32 %v2196_v3, 0.0  ;;  %v4192_v37 = vpop.f32.mrf.mxu1  ;;  %v1823_v8 = vadd.f32 %v4470_v13, %v4469_v14  ;;  %v2211_v32 = vmax.f32 %v2179_v30, 0.0  ;;  %v1825_v33 = vadd.f32 %v4472_v57, %v4471_v21 }
 0x184   : > { %v2230_v9 = vmax.f32 %v2198_v42, 0.0  ;;  %v4196_v23 = vpop.f32.mrf.mxu0  ;;  %v1830_v56 = vadd.f32 %v4474_v11, %v4473_v29  ;;  %v2204_v3 = vmax.f32 %v2172_v18, 0.0  ;;  %v1832_v42 = vadd.f32 %v4476_v46, %v4475_v7 }
 0x185   : > { %v4200_v43 = vpop.f32.mrf.mxu1  ;;  %2280 = vmatprep.subr.mxu0 %v2228_v4  ;;  %v1831_v54 = vadd.f32 %v4478_v15, %v4477_v34  ;;  %v2206_v25 = vmax.f32 %v2174_v36, 0.0  ;;  %v2203_v30 = vmax.f32 %v2171_v59, 0.0  ;;  %v2205_v36 = vmax.f32 %v2173_v5, 0.0  ;;  %v4483_v59 = vld [vmem:[#allocation38_spill] sm:$0xff] }
 0x186   : > { %2357 = vmatprep.subr.mxu1 %v2230_v9  ;;  %v2049_v49 = vpop.f32.mrf.mxu0  ;;  %2281 = vmatpush1.msra.mxu0 %v2227_v47  ;;  %v4479_v47 = vld [vmem:[#allocation27_spill] sm:$0xff]  ;;  %v1839_v58 = vadd.f32 %v4483_v59, %v4138_v48  ;;  %v2127_v21 = vadd.f32 %v4196_v23, %v1822_v55 }
 0x187   : > { %v2102_v24 = vpop.f32.mrf.mxu1  ;;  %2358 = vmatpush1.msra.mxu1 %v2229_v45  ;;  %2282 = vmatprep.subr.mxu0 %v2220_v61  ;;  %v4480_v9 = vld [vmem:[#allocation35_spill] sm:$0xff]  ;;  %v1838_v61 = vadd.f32 %v4481_v27, %v4132_v17  ;;  %v4482_v45 = vld [vmem:[#allocation37_spill] sm:$0xff]  ;;  %v2120_v17 = vadd.f32 %v4185_v39, %v4164_v1  ;;  %v2128_v39 = vadd.f32 %v2049_v49, %v1823_v8 }
 0x188   : > { %2359 = vmatprep.subr.mxu1 %v2222_v22  ;;  %v2053_v28 = vpop.f32.mrf.mxu0  ;;  %2283 = vmatpush1.msra.mxu0 %v2219_v19  ;;  %v1833_v18 = vadd.f32 %v4480_v9, %v4479_v47  ;;  %v1840_v19 = vadd.f32 %v4482_v45, %v4135_v35  ;;  %v4246_v1 = vld [vmem:[%s4409_s7 + $0x8] sm:$0xff]  ;;  %v2130_v57 = vadd.f32 %v2102_v24, %v1825_v33 }
 0x189   : > { %v2106_v6 = vpop.f32.mrf.mxu1  ;;  %2360 = vmatpush1.msra.mxu1 %v2221_v16  ;;  %2284 = vmatprep.subr.mxu0 %v2212_v63  ;;  %v1841_v63 = vadd.f32 %v4484_v53, %v4141_v44  ;;  %v2119_v16 = vadd.f32 %v4174_v50, %v4158_v20  ;;  %v2135_v48 = vadd.f32 %v2053_v28, %v1830_v56  ;;  %v4485_v20 = vmov 0.0  }
 0x18a   : > { %2361 = vmatprep.subr.mxu1 %v2214_v62  ;;  %v2055_v4 = vpop.f32.mrf.mxu0  ;;  %2285 = vmatpush1.msra.mxu0 %v2211_v32  ;;  %v2122_v50 = vadd.f32 %v4192_v37, %v4167_v26  ;;  %v2137_v32 = vadd.f32 %v2106_v6, %v1832_v42  ;;  %v2129_v56 = vadd.f32 %v4200_v43, %v1824_v12 }
 0x18b   : > { %v2108_v22 = vpop.f32.mrf.mxu1  ;;  %2362 = vmatpush1.msra.mxu1 %v2213_v31  ;;  %2286 = vmatprep.subr.mxu0 %v2204_v3  ;;  %v2136_v35 = vadd.f32 %v2055_v4, %v1831_v54  ;;  %v2191_v37 = vadd.f32 %v4171_v41, %v2135_v48  ;;  %v2121_v43 = vadd.f32 %v4179_v60, %v4161_v10 }
 0x18c   : > { %2363 = vmatprep.subr.mxu1 %v2206_v25  ;;  %v2057_v0 = vpop.f32.mrf.mxu0  ;;  %2287 = vmatpush1.msra.mxu0 %v2203_v30  ;;  %v2138_v5 = vadd.f32 %v2108_v22, %v1833_v18  ;;  %v2184_v55 = vadd.f32 %v4169_v2, %v2128_v39  ;;  %v2193_v24 = vadd.f32 %v4171_v41, %v2137_v32  ;;  %v3251_v32 = vmov 1966171168  }
 0x18d   : > { %v2143_v51 = vadd.f32 %v2057_v0, %v1838_v61  ;;  %v2110_v14 = vpop.f32.mrf.mxu1  ;;  %2364 = vmatpush1.msra.mxu1 %v2205_v36  ;;  %3036 = vmatmul.mubr.msk.f32.vlgmr.msra.gmra.mxu0 %vm2249_vm1, %v4222_v38  ;;  %v2192_v3 = vadd.f32 %v4171_v41, %v2136_v35  ;;  %v2183_v8 = vadd.f32 %v4169_v2, %v2127_v21  ;;  %v2223_v60 = vmax.f32 %v2191_v37, 0.0  ;;  %v4488_v36 = vld [vmem:[#allocation12_spill] sm:$0xff] }
 0x18e   : > { %v2145_v13 = vadd.f32 %v2110_v14, %v1840_v19  ;;  %3038 = vmatmul.mubr.msk.f32.vlgmr.msra.gmra.mxu1 %vm2249_vm1, %v4222_v38  ;;  %v2059_v44 = vpop.f32.mrf.mxu0  ;;  %2326 = vmatprep.mubr.f32.mxu0 %v4485_v20  ;;  %v2194_v49 = vadd.f32 %v4171_v41, %v2138_v5  ;;  %v2186_v33 = vadd.f32 %v4169_v2, %v2130_v57  ;;  %v2216_v25 = vmax.f32 %v2184_v55, 0.0  ;;  %v4487_v19 = vld [vmem:[#allocation11_spill] sm:$0xff] }
 0x18f   : > { %v2144_v62 = vadd.f32 %v2059_v44, %v1839_v58  ;;  %v2112_v28 = vpop.f32.mrf.mxu1  ;;  %2403 = vmatprep.mubr.f32.mxu1 %v4485_v20  ;;  %v2199_v29 = vadd.f32 %v4149_v40, %v2143_v51  ;;  %v2176_v7 = vadd.f32 %v4188_v52, %v2120_v17  ;;  %v2185_v46 = vadd.f32 %v4169_v2, %v2129_v56  ;;  %v4489_v58 = vld [vmem:[#allocation13_spill] sm:$0xff]  ;;  %v4493_v51 = vld [vmem:[#allocation18_spill] sm:$0xff] }
 0x190   : > { %v2146_v11 = vadd.f32 %v2112_v28, %v1841_v63  ;;  %v2201_v31 = vadd.f32 %v4149_v40, %v2145_v13  ;;  %v2224_v42 = vmax.f32 %v2192_v3, 0.0  ;;  %v2175_v10 = vadd.f32 %v4188_v52, %v2119_v16  ;;  %v4490_v63 = vld [vmem:[#allocation15_spill] sm:$0xff]  ;;  %v4491_v16 = vld [vmem:[#allocation16_spill] sm:$0xff]  ;;  %v4492_v17 = vld [vmem:[#allocation17_spill] sm:$0xff] }
 0x191   : > { %v2200_v26 = vadd.f32 %v4149_v40, %v2144_v62  ;;  %3037 = vmatmul.mubr.msk.f32.gmra.mxu0 %vm2249_vm1, %v4246_v1  ;;  %v2178_v41 = vadd.f32 %v4188_v52, %v2122_v50  ;;  %v2226_v15 = vmax.f32 %v2194_v49, 0.0  ;;  %v2177_v54 = vadd.f32 %v4188_v52, %v2121_v43  ;;  %v4486_v52 = vld [vmem:[#allocation10_spill] sm:$0xff] }
 0x192   : > { %v2202_v23 = vadd.f32 %v4149_v40, %v2146_v11  ;;  %3039 = vmatmul.mubr.msk.f32.gmra.mxu1 %vm2249_vm1, %v4246_v1  ;;  %2474 = vmatprep.mubr.f32.mxu0 %v4485_v20  ;;  %v2231_v40 = vmax.f32 %v2199_v29, 0.0  ;;  %v2233_v34 = vmax.f32 %v2201_v31, 0.0  ;;  %v2225_v4 = vmax.f32 %v2193_v24, 0.0 }
 0x193   : > { %v2232_v12 = vmax.f32 %v2200_v26, 0.0  ;;  %2551 = vmatprep.mubr.f32.mxu1 %v4485_v20  ;;  %v2215_v30 = vmax.f32 %v2183_v8, 0.0  ;;  %v2218_v47 = vmax.f32 %v2186_v33, 0.0  ;;  %v2208_v2 = vmax.f32 %v2176_v7, 0.0 }
 0x194   : > { %v2234_v6 = vmax.f32 %v2202_v23, 0.0  ;;  %v2217_v9 = vmax.f32 %v2185_v46, 0.0  ;;  %v2207_v18 = vmax.f32 %v2175_v10, 0.0  ;;  %v2210_v27 = vmax.f32 %v2178_v41, 0.0 }
 0x195   : > { %2434 = vmatprep.subr.mxu0 %v2232_v12  ;;  %v2209_v61 = vmax.f32 %v2177_v54, 0.0  ;;  %v928_v45 = vrot.slane %v4486_v52, 4  ;;  %v935_v22 = vrot.slane %v4487_v19, 4  ;;  %v942_v59 = vrot.slane %v4488_v36, 4 }
 0x196   : > { %2511 = vmatprep.subr.mxu1 %v2234_v6  ;;  %2435 = vmatpush1.msra.mxu0 %v2231_v40  ;;  %v949_v53 = vrot.slane %v4489_v58, 4  ;;  %v963_v0 = vrot.slane %v4491_v16, 4  ;;  %v970_v35 = vrot.slane %v4492_v17, 4  ;;  %v977_v14 = vrot.slane %v4493_v51, 4 }
 0x197   : > { %2512 = vmatpush1.msra.mxu1 %v2233_v34  ;;  %2436 = vmatprep.subr.mxu0 %v2224_v42  ;;  %v929_v48 = vadd.f32 %v928_v45, %v4486_v52  ;;  %v936_v5 = vadd.f32 %v935_v22, %v4487_v19  ;;  %v943_v13 = vadd.f32 %v942_v59, %v4488_v36  ;;  %v2681_v62 = vunpack.c.l.s4 %v3251_v32  ;;  %v4494_v59 = vld [vmem:[#allocation14_spill] sm:$0xff] }
 0x198   : > { %2513 = vmatprep.subr.mxu1 %v2226_v15  ;;  %2437 = vmatpush1.msra.mxu0 %v2223_v60  ;;  %v950_v44 = vadd.f32 %v949_v53, %v4489_v58  ;;  %v971_v50 = vadd.f32 %v970_v35, %v4492_v17  ;;  %v978_v39 = vadd.f32 %v977_v14, %v4493_v51 }
 0x199   : > { %2514 = vmatpush1.msra.mxu1 %v2225_v4  ;;  %2438 = vmatprep.subr.mxu0 %v2216_v25  ;;  %v930_v28 = vrot.slane %v929_v48, 2  ;;  %v937_v21 = vrot.slane %v936_v5, 2  ;;  %v944_v57 = vrot.slane %v943_v13, 2  ;;  %v2682_v26 = vunpack.c.0.s8 %v2681_v62 }
 0x19a   : > { %2515 = vmatprep.subr.mxu1 %v2218_v47  ;;  %2439 = vmatpush1.msra.mxu0 %v2215_v30  ;;  %v951_v29 = vrot.slane %v950_v44, 2  ;;  %v972_v3 = vrot.slane %v971_v50, 2  ;;  %v979_v31 = vrot.slane %v978_v39, 2 }
 0x19b   : > { %2516 = vmatpush1.msra.mxu1 %v2217_v9  ;;  %2440 = vmatprep.subr.mxu0 %v2208_v2  ;;  %v931_v37 = vadd.f32 %v930_v28, %v929_v48  ;;  %v938_v49 = vadd.f32 %v937_v21, %v936_v5  ;;  %v945_v23 = vadd.f32 %v944_v57, %v943_v13  ;;  %v2242_v13 = vpop.permute.xlu0 %2241 }
 0x19c   : > { %2517 = vmatprep.subr.mxu1 %v2210_v27  ;;  %2441 = vmatpush1.msra.mxu0 %v2207_v18  ;;  %v952_v43 = vadd.f32 %v951_v29, %v950_v44  ;;  %v973_v12 = vadd.f32 %v972_v3, %v971_v50  ;;  %v980_v8 = vadd.f32 %v979_v31, %v978_v39  ;;  %v4318_v50 = vpop.permute.xlu1 %2246 }
 0x19d   : > { %2518 = vmatpush1.msra.mxu1 %v2209_v61  ;;  %3040 = vmatmul.mubr.msk.f32.vlgmr.msra.gmra.mxu0 %vm2249_vm1, %v4222_v38  ;;  %v932_v33 = vrot.slane %v931_v37, 1  ;;  %v939_v40 = vrot.slane %v938_v49, 1  ;;  %v946_v6 = vrot.slane %v945_v23, 1  ;;  %v4304_v58 = vsub.s32 %v2682_v26, %v4494_v59 }
 0x19e   : > { %3042 = vmatmul.mubr.msk.f32.vlgmr.msra.gmra.mxu1 %vm2249_vm1, %v4222_v38  ;;  %2480 = vmatprep.mubr.f32.mxu0 %v4485_v20  ;;  %v956_v38 = vrot.slane %v4490_v63, 4  ;;  %v953_v7 = vrot.slane %v952_v43, 1  ;;  %v974_v34 = vrot.slane %v973_v12, 1  ;;  %v981_v10 = vrot.slane %v980_v8, 1 }
 0x19f   : > { %2557 = vmatprep.mubr.f32.mxu1 %v4485_v20  ;;  %v933_v41 = vadd.f32 %v932_v33, %v931_v37  ;;  %v940_v60 = vadd.f32 %v939_v40, %v938_v49  ;;  %v947_v15 = vadd.f32 %v946_v6, %v945_v23 }
 0x1a0   : > { %v957_v20 = vadd.f32 %v956_v38, %v4490_v63  ;;  %v954_v54 = vadd.f32 %v953_v7, %v952_v43  ;;  %v975_v30 = vadd.f32 %v974_v34, %v973_v12  ;;  %v982_v47 = vadd.f32 %v981_v10, %v980_v8 }
 0x1a1   : > { %3041 = vmatmul.mubr.msk.f32.gmra.mxu0 %vm2249_vm1, %v4246_v1  ;;  %v983_v2 = vmul.f32 0.5, %v933_v41  ;;  %v984_v9 = vmul.f32 0.5, %v940_v60  ;;  %v985_v18 = vmul.f32 0.5, %v947_v15 }
 0x1a2   : > { %3043 = vmatmul.mubr.msk.f32.gmra.mxu1 %vm2249_vm1, %v4246_v1  ;;  %v964_v1 = vadd.f32 %v963_v0, %v4491_v16  ;;  %v958_v11 = vrot.slane %v957_v20, 2  ;;  %v986_v27 = vmul.f32 0.5, %v954_v54  ;;  %v989_v45 = vmul.f32 0.5, %v975_v30 }
 0x1a3   : > { %v990_v19 = vmul.f32 0.5, %v982_v47  ;;  %v2676_v22 = vcombine.low %v983_v2, %v984_v9 }
 0x1a4   : > { %v965_v56 = vrot.slane %v964_v1, 2  ;;  %v959_v55 = vadd.f32 %v958_v11, %v957_v20  ;;  %v2677_v36 = vcombine.low %v985_v18, %v986_v27 }
 0x1a5   : > { %v2679_v63 = vcombine.low %v989_v45, %v990_v19  ;;  %v2686_v38 = vrot.slane %v2676_v22, %v4304_v58 }
 0x1a6   : > { %v966_v24 = vadd.f32 %v965_v56, %v964_v1  ;;  %v960_v46 = vrot.slane %v959_v55, 1  ;;  %v2693_v16 = vrot.slane %v2677_v36, %v4304_v58 }
 0x1a7   : > { %v2707_v17 = vrot.slane %v2679_v63, %v4304_v58 }
 0x1a8   : > { %v967_v42 = vrot.slane %v966_v24, 1  ;;  %v961_v25 = vadd.f32 %v960_v46, %v959_v55  ;;  %v2708_v35 = vcombine.low %v2686_v38, %v2693_v16  ;;  %v4323_v55 = vpop.permute.xlu0 %2584 }
 0x1aa   : > { %v968_v4 = vadd.f32 %v967_v42, %v966_v24  ;;  %v987_v61 = vmul.f32 0.5, %v961_v25  ;;  %v4311_v14 = vrot.slane %v2708_v35, %v4304_v58  ;;  %v4325_v24 = vpop.permute.xlu1 %2589 }
 0x1ac   : > { %v988_v52 = vmul.f32 0.5, %v968_v4 }
 0x1ae   : > { %v2678_v53 = vcombine.low %v987_v61, %v988_v52 }
 0x1b0   : > { %v2700_v0 = vrot.slane %v2678_v53, %v4304_v58 }
 0x1b2   : > { %v2709_v51 = vcombine.low %v2700_v0, %v2707_v17 }
 0x1b4   : > { %v4314_v48 = vrot.slane %v2709_v51, %v4304_v58 }
 0x1b6   : > { %v2724_v5 = vcombine.low %v4311_v14, %v4314_v48 }
 0x24d   : > { %v2322_v44 = vpop.f32.mrf.mxu0 }
 0x24e   : > { %v2323_v20 = vadd.f32 %v2322_v44, %v2242_v13  ;;  %v2399_v1 = vpop.f32.mrf.mxu1 }
 0x24f   : > { %v2400_v39 = vadd.f32 %v2399_v1, %v2242_v13  ;;  %v2324_v32 = vpop.f32.mrf.mxu0 }
 0x250   : > { %v2325_v62 = vadd.f32 %v2324_v32, %v2242_v13  ;;  %v2401_v28 = vpop.f32.mrf.mxu1  ;;  %v2564_v29 = vmax.f32 %v2323_v20, 0.0 }
 0x251   : > { %v2402_v21 = vadd.f32 %v2401_v28, %v2242_v13  ;;  %v2328_v57 = vpop.f32.mrf.mxu0  ;;  %v2566_v3 = vmax.f32 %v2400_v39, 0.0 }
 0x252   : > { %v2329_v11 = vadd.f32 %v2328_v57, %v4318_v50  ;;  %v2405_v56 = vpop.f32.mrf.mxu1  ;;  %v2565_v37 = vmax.f32 %v2325_v62, 0.0  ;;  %v2592_v40 = vmul.f32 %v4323_v55, %v2564_v29 }
 0x253   : > { %v2406_v31 = vadd.f32 %v2405_v56, %v4318_v50  ;;  %v2330_v26 = vpop.f32.mrf.mxu0  ;;  %v2567_v12 = vmax.f32 %v2402_v21, 0.0  ;;  %v2594_v46 = vmul.f32 %v4323_v55, %v2566_v3 }
 0x254   : > { %v2572_v49 = vmax.f32 %v2329_v11, 0.0  ;;  %v2331_v23 = vadd.f32 %v2330_v26, %v4318_v50  ;;  %v2407_v43 = vpop.f32.mrf.mxu1  ;;  %v2593_v10 = vmul.f32 %v4323_v55, %v2565_v37 }
 0x255   : > { %v2574_v8 = vmax.f32 %v2406_v31, 0.0  ;;  %v2408_v33 = vadd.f32 %v2407_v43, %v4318_v50  ;;  %v2595_v15 = vmul.f32 %v4323_v55, %v2567_v12 }
 0x256   : > { %v2600_v6 = vmul.f32 %v4325_v24, %v2572_v49  ;;  %v2573_v7 = vmax.f32 %v2331_v23, 0.0 }
 0x257   : > { %v2602_v42 = vmul.f32 %v4325_v24, %v2574_v8  ;;  %v2575_v34 = vmax.f32 %v2408_v33, 0.0 }
 0x258   : > { %v2608_v41 = vadd.f32 %v2600_v6, %v2592_v40  ;;  %v2601_v60 = vmul.f32 %v4325_v24, %v2573_v7 }
 0x259   : > { %v2622_v54 = vadd.f32 %v2602_v42, %v2594_v46  ;;  %v2603_v25 = vmul.f32 %v4325_v24, %v2575_v34 }
 0x25a   : > { %v2615_v4 = vadd.f32 %v2601_v60, %v2593_v10  ;;  %v2609_v30 = vrot.slane %v2608_v41, 4 }
 0x25b   : > { %v2629_v47 = vadd.f32 %v2603_v25, %v2595_v15  ;;  %v2623_v9 = vrot.slane %v2622_v54, 4 }
 0x25c   : > { %v2616_v2 = vrot.slane %v2615_v4, 4  ;;  %v2610_v52 = vadd.f32 %v2609_v30, %v2608_v41 }
 0x25d   : > { %v2630_v18 = vrot.slane %v2629_v47, 4  ;;  %v2476_v27 = vpop.f32.mrf.mxu0  ;;  %v2624_v53 = vadd.f32 %v2623_v9, %v2622_v54 }
 0x25e   : > { %v2553_v61 = vpop.f32.mrf.mxu1  ;;  %v2617_v45 = vadd.f32 %v2616_v2, %v2615_v4  ;;  %v2477_v36 = vadd.f32 %v2476_v27, %v2242_v13  ;;  %v2611_v35 = vrot.slane %v2610_v52, 2 }
 0x25f   : > { %v2631_v19 = vadd.f32 %v2630_v18, %v2629_v47  ;;  %v2478_v22 = vpop.f32.mrf.mxu0  ;;  %v2554_v63 = vadd.f32 %v2553_v61, %v2242_v13  ;;  %v2625_v62 = vrot.slane %v2624_v53, 2 }
 0x260   : > { %v2555_v59 = vpop.f32.mrf.mxu1  ;;  %v2479_v38 = vadd.f32 %v2478_v22, %v2242_v13  ;;  %v2618_v51 = vrot.slane %v2617_v45, 2  ;;  %v2568_v1 = vmax.f32 %v2477_v36, 0.0  ;;  %v2612_v3 = vadd.f32 %v2611_v35, %v2610_v52 }
 0x261   : > { %v2482_v16 = vpop.f32.mrf.mxu0  ;;  %v2556_v0 = vadd.f32 %v2555_v59, %v2242_v13  ;;  %v2632_v44 = vrot.slane %v2631_v19, 2  ;;  %v2570_v28 = vmax.f32 %v2554_v63, 0.0  ;;  %v2626_v8 = vadd.f32 %v2625_v62, %v2624_v53 }
 0x262   : > { %v2559_v17 = vpop.f32.mrf.mxu1  ;;  %v2483_v39 = vadd.f32 %v2482_v16, %v4318_v50  ;;  %v2569_v21 = vmax.f32 %v2479_v38, 0.0  ;;  %v2619_v31 = vadd.f32 %v2618_v51, %v2617_v45  ;;  %v2596_v49 = vmul.f32 %v4323_v55, %v2568_v1 }
 0x263   : > { %v2484_v20 = vpop.f32.mrf.mxu0  ;;  %v2560_v57 = vadd.f32 %v2559_v17, %v4318_v50  ;;  %v2571_v29 = vmax.f32 %v2556_v0, 0.0  ;;  %v2633_v26 = vadd.f32 %v2632_v44, %v2631_v19  ;;  %v2598_v33 = vmul.f32 %v4323_v55, %v2570_v28 }
 0x264   : > { %v2561_v32 = vpop.f32.mrf.mxu1  ;;  %v2576_v11 = vmax.f32 %v2483_v39, 0.0  ;;  %v2485_v56 = vadd.f32 %v2484_v20, %v4318_v50  ;;  %v2597_v40 = vmul.f32 %v4323_v55, %v2569_v21  ;;  %v2620_v34 = vrot.slane %v2619_v31, 1 }
 0x265   : > { %v2562_v13 = vadd.f32 %v2561_v32, %v4318_v50  ;;  %v2578_v37 = vmax.f32 %v2560_v57, 0.0  ;;  %v2599_v50 = vmul.f32 %v4323_v55, %v2571_v29  ;;  %v2634_v10 = vrot.slane %v2633_v26, 1  ;;  %v2665_v57 = vld [vmem:[%s603_s14] sm:$0xff]  ;;  %s3252_s14 = smov [#allocation7]  }
 0x266   : > { %v2604_v23 = vmul.f32 %v4325_v24, %v2576_v11  ;;  %v2577_v43 = vmax.f32 %v2485_v56, 0.0  ;;  %v2613_v25 = vrot.slane %v2612_v3, 1  ;;  %v2627_v4 = vrot.slane %v2626_v8, 1  ;;  %s3110_s0 = sshll.u32 %s3252_s14, 4  ;;  %s3111_s0 = int_to_ptr.vmem [resolvable:$false] %s3110_s0 }
 0x267   : > { %v2579_v12 = vmax.f32 %v2562_v13, 0.0  ;;  %v2606_v6 = vmul.f32 %v4325_v24, %v2578_v37  ;;  %v2621_v55 = vadd.f32 %v2620_v34, %v2619_v31  ;;  %v2666_v29 = vstv %s2664_s16  ;;  %s2800_s16 = scalar_lea.hbm %s4413_s11, %s3053_s23  ;;  %s3112_s10 = scalar_lea.vmem %s3111_s0, 256 }
 0x268   : > { %v2636_v7 = vadd.f32 %v2604_v23, %v2596_v49  ;;  %v2605_v46 = vmul.f32 %v4325_v24, %v2577_v43  ;;  %v2614_v45 = vadd.f32 %v2613_v25, %v2612_v3  ;;  %v2628_v19 = vadd.f32 %v2627_v4, %v2626_v8  ;;  %p3113_p3 = scmp.lt.s32.totalorder %s2803_s12, %s3111_s0  ;;  %p3114_p4 = scmp.lt.s32.totalorder %s3112_s10, %s3106_s18 }
 0x269   : > { %v2607_v42 = vmul.f32 %v4325_v24, %v2579_v12  ;;  %v2650_v41 = vadd.f32 %v2606_v6, %v2598_v33  ;;  %v2635_v24 = vadd.f32 %v2634_v10, %v2633_v26  ;;  %v2667_v13 = vadd.f32 %v2666_v29, %v2665_v57 }
 0x26a   : > { %v2637_v60 = vrot.slane %v2636_v7, 4  ;;  %v2643_v15 = vadd.f32 %v2605_v46, %v2597_v40  ;;  %v2735_v63 = vcombine.low %v2614_v45, %v2621_v55  ;;  %p3115_p5 = por %p3114_p4, %p3113_p3 }
 0x26b   : > { %v2657_v54 = vadd.f32 %v2607_v42, %v2599_v50  ;;  %v2651_v30 = vrot.slane %v2650_v41, 4  ;;  %v2736_v38 = vcombine.low %v2628_v19, %v2635_v24  ;;  %v2726_v49 = vadd.f32 %v2724_v5, %v2667_v13 }
 0x26c   : > { %v2638_v47 = vadd.f32 %v2637_v60, %v2636_v7  ;;  %v2644_v2 = vrot.slane %v2643_v15, 4  ;;  %v2745_v1 = vrot.slane %v2735_v63, %v4304_v58  ;;  %p3116_p7 = pnand %p3115_p5, %p3109_p2 }
 0x26d   : > { %v2658_v9 = vrot.slane %v2657_v54, 4  ;;  %v2652_v18 = vadd.f32 %v2651_v30, %v2650_v41  ;;  %v2752_v39 = vrot.slane %v2736_v38, %v4304_v58 }
 0x26e   : > { %v2639_v27 = vrot.slane %v2638_v47, 2  ;;  %v2645_v61 = vadd.f32 %v2644_v2, %v2643_v15 }
 0x26f   : > { %v2659_v52 = vadd.f32 %v2658_v9, %v2657_v54  ;;  %v2653_v22 = vrot.slane %v2652_v18, 2  ;;  %v2767_v26 = vcombine.low %v2745_v1, %v2752_v39 }
 0x270   : > { %v2640_v36 = vadd.f32 %v2639_v27, %v2638_v47  ;;  %v2646_v59 = vrot.slane %v2645_v61, 2 }
 0x271   : > { %v2660_v53 = vrot.slane %v2659_v52, 2  ;;  %v2654_v16 = vadd.f32 %v2653_v22, %v2652_v18  ;;  %v2775_v23 = vrot.slane %v2767_v26, %v4304_v58 }
 0x272   : > { %v2641_v0 = vrot.slane %v2640_v36, 1  ;;  %v2647_v17 = vadd.f32 %v2646_v59, %v2645_v61 }
 0x273   : > { %v2661_v35 = vadd.f32 %v2660_v53, %v2659_v52  ;;  %v2655_v51 = vrot.slane %v2654_v16, 1 }
 0x274   : > { %v2648_v44 = vrot.slane %v2647_v17, 1  ;;  %v2642_v32 = vadd.f32 %v2641_v0, %v2640_v36 }
 0x275   : > { %v2662_v20 = vrot.slane %v2661_v35, 1  ;;  %v2656_v62 = vadd.f32 %v2655_v51, %v2654_v16 }
 0x276   : > { %v2649_v28 = vadd.f32 %v2648_v44, %v2647_v17 }
 0x277   : > { %v2663_v21 = vadd.f32 %v2662_v20, %v2661_v35 }
 0x278   : > { %v2737_v11 = vcombine.low %v2642_v32, %v2649_v28 }
 0x279   : > { %v2738_v56 = vcombine.low %v2656_v62, %v2663_v21 }
 0x27a   : > { %v2759_v3 = vrot.slane %v2737_v11, %v4304_v58 }
 0x27b   : > { %v2766_v31 = vrot.slane %v2738_v56, %v4304_v58 }
 0x27d   : > { %v2768_v37 = vcombine.low %v2759_v3, %v2766_v31 }
 0x27f   : > { %v2782_v43 = vrot.slane %v2768_v37, %v4304_v58 }
 0x281   : > { %v2783_v12 = vcombine.low %v2775_v23, %v2782_v43 }
 0x283   : > { %v2785_v8 = vadd.f32 %v2783_v12, %v2726_v49 }
 0x285   : > { %2786 = vst [vmem:[%s595_s26] sm:$0xff] %v2785_v8 }
 0x286   : > { %3119 = shalt.err (!%p3116_p7)
}
 0x287   : > { %s3120_s25 = scalar_lea.hbm %s2800_s16, 128  ;;  %s3124_s26 = scalar_lea.hbm %s4413_s11, 512 }
 0x288   : > { %p3121_p9 = scmp.ne.s32.totalorder %s2800_s16, %s3120_s25  ;;  %p3125_p12 = scmp.lt.s32.totalorder %s2800_s16, %s4413_s11 }
 0x289   : > { %p3126_p13 = scmp.lt.s32.totalorder %s3124_s26, %s3120_s25 }
 0x28a   : > { %p3122_p10 = pnand %p3121_p9, %p3359_p6 }
 0x28b   : > { %p3127_p0 = por %p3126_p13, %p3125_p12 }
 0x28c   : > { %p3123_p11 = pneg %p3122_p10 }
 0x28e   : > { %p3128_p1 = pnand %p3127_p0, %p3123_p11 }
 0x290   : > { %3131 = shalt.err (!%p3128_p1)
}
 0x291   : > { %3054 = dma.vmem_to_hbm [thread:$0]  (%p3359_p6), %s2803_s12, 128, %s2800_s16, %s2788_s17  }
 0x292 PF: > { %p3060_p2 = scmp.ge.s32.totalorder %s3246_s22, 2  ;;  %s2814_s0 = sand.u32 1, %s3234_s19  }
 0x293   : > { %s2815_s18 = scalar_lea.sflag [#allocation8], %s2814_s0 }
 0x294   : > { %p3057_p3 = pnand %p3060_p2, %p3363_p8 }
 0x296   : > { %p3058_p4 = pneg %p3057_p3 }
 0x298   : > { %3149 = dma.done.wait (%p3058_p4), %s2815_s18, 128  }
 0x299   : > { %3151 = vsyncadd (%p3058_p4), %s2815_s18, 4294967168  ;;  %p22_p5 = scmp.ge.s32.totalorder %s3341_s24, 6   ;;  %s4496_s19 = smov %s3238_s20 }
 0x29a   : > { %s4497_s20 = smov %s3242_s21  ;;  %s4498_s21 = smov %s3353_s27 }
 0x29b   : > { %s4499_s22 = smov %s3341_s24  ;;  %24 = sbr.rel (!%p22_p5) target bundleno = 6 (0x6), region = 226 }
 0x2a0   :  { %2820 = vsyncpa [#allocation8], 1 }
 0x2a1   :  { %2822 = vsyncpa [#allocation8 + $0x1], 1 }

</bundles_post_ra>
